<compile_context>
chip_gen: v6e
topology: v6e:2x2x1
jax: 0.10.0
libtpu: 0.0.40
codegen_flags: <defaults>
</compile_context>

<pallas_src>
import functools

import jax
import jax.numpy as jnp
from jax.experimental import pallas as pl
from jax.experimental.pallas import tpu as pltpu

H1, H2 = 512, 256
DROP_P = 0.15
LANE = 128
SUBLANE = 8
MAX_TM = 128  # batch tile (128 keeps v5e MXU rows full; fine on v6e/v7x too)


def classifier_kernel(x_ref, bits1_ref, bits2_ref,
                      w1_ref, b1_ref, w2_ref, b2_ref, w3_ref, b3_ref,
                      out_ref):
    scale = jnp.float32(1.0 / (1.0 - DROP_P))
    # keep iff uniform_u32 >= p * 2^32  ->  P(keep) = 1 - p
    thresh = jnp.uint32(int(round(DROP_P * (1 << 32))))

    def relu_dropout(h, bits):
        # Fused ReLU + dropout: single select on the VPU.
        keep = (bits >= thresh) & (h > 0.0)
        return jnp.where(keep, h * scale, 0.0)

    x = x_ref[...]  # bf16 (TM, in_features)

    # fc1 -> relu -> dropout   (accumulate in f32, epilogue in f32)
    h = jnp.dot(x, w1_ref[...], preferred_element_type=jnp.float32) + b1_ref[...]
    h = relu_dropout(h, bits1_ref[...])

    # fc2 -> relu -> dropout
    h = h.astype(w2_ref.dtype)  # bf16 into the MXU
    h = jnp.dot(h, w2_ref[...], preferred_element_type=jnp.float32) + b2_ref[...]
    h = relu_dropout(h, bits2_ref[...])

    # fc3 (logits, lane-padded to 128; no activation)
    h = h.astype(w3_ref.dtype)
    out = jnp.dot(h, w3_ref[...], preferred_element_type=jnp.float32) + b3_ref[...]
    out_ref[...] = out.astype(out_ref.dtype)


def _round_up(x, m):
    return (x + m - 1) // m * m


@functools.partial(jax.jit, static_argnames=("seed",))
def simple_classifier(x, params, seed=0):
    """x: (B, C, H, W) float-like. Returns logits (B, num_classes) float32."""
    w1, b1, w2, b2, w3, b3 = params
    B = x.shape[0]
    x2d = x.reshape(B, -1)
    in_features = x2d.shape[1]
    num_classes = w3.shape[1]

    # ---- batch padding / tiling (sublane-aligned, MXU-row friendly) ----
    tm = min(MAX_TM, _round_up(B, SUBLANE))
    b_pad = _round_up(B, tm)
    grid = (b_pad // tm,)

    x2d = jnp.pad(x2d, ((0, b_pad - B), (0, 0))).astype(jnp.bfloat16)

    # ---- lane-dense fc3: pad num_classes -> multiple of 128 ----
    ncp = _round_up(num_classes, LANE)
    w3p = jnp.pad(w3, ((0, 0), (0, ncp - num_classes)))
    b3p = jnp.pad(b3, ((0, 0), (0, ncp - num_classes)))

    # ---- bf16 weights into the MXU, f32 biases for the f32 epilogue ----
    w1b = w1.astype(jnp.bfloat16)
    w2b = w2.astype(jnp.bfloat16)
    w3b = w3p.astype(jnp.bfloat16)
    b1f = b1.astype(jnp.float32)
    b2f = b2.astype(jnp.float32)
    b3f = b3p.astype(jnp.float32)

    # ---- dropout random bits (wrapper-side RNG; in-kernel integer threshold) ----
    k1, k2 = jax.random.split(jax.random.PRNGKey(seed))
    bits1 = jax.random.bits(k1, (b_pad, H1), dtype=jnp.uint32)
    bits2 = jax.random.bits(k2, (b_pad, H2), dtype=jnp.uint32)

    # Weight index_maps are constant -> weights stay VMEM-resident across the
    # batch grid.  (For very large in_features on v7x's 64 MiB VMEM, tile K
    # with an f32 accumulator instead of loading all of w1 at once.)
    out_pad = pl.pallas_call(
        classifier_kernel,
        out_shape=jax.ShapeDtypeStruct((b_pad, ncp), jnp.float32),
        grid=grid,
        in_specs=[
            pl.BlockSpec((tm, in_features), lambda i: (i, 0)),   # x tile
            pl.BlockSpec((tm, H1), lambda i: (i, 0)),            # dropout bits 1
            pl.BlockSpec((tm, H2), lambda i: (i, 0)),            # dropout bits 2
            pl.BlockSpec((in_features, H1), lambda i: (0, 0)),   # w1 (resident)
            pl.BlockSpec((1, H1), lambda i: (0, 0)),             # b1
            pl.BlockSpec((H1, H2), lambda i: (0, 0)),            # w2
            pl.BlockSpec((1, H2), lambda i: (0, 0)),             # b2
            pl.BlockSpec((H2, ncp), lambda i: (0, 0)),           # w3 (lane-padded)
            pl.BlockSpec((1, ncp), lambda i: (0, 0)),            # b3
        ],
        out_specs=pl.BlockSpec((tm, ncp), lambda i: (i, 0)),     # lane-dense out
        compiler_params=pltpu.CompilerParams(
            dimension_semantics=("parallel",)),
    )(x2d, bits1, bits2, w1b, b1f, w2b, b2f, w3b, b3f)

    return out_pad[:B, :num_classes]


def init_params(key, input_size, num_classes):
    """Deterministic init mimicking nn.Linear's U(-1/sqrt(fan_in), 1/sqrt(fan_in))."""
    def linear(k, fan_in, fan_out):
        kw, kb = jax.random.split(k)
        bound = 1.0 / jnp.sqrt(fan_in)
        w = jax.random.uniform(kw, (fan_in, fan_out), jnp.float32, -bound, bound)
        b = jax.random.uniform(kb, (1, fan_out), jnp.float32, -bound, bound)
        return w, b

    k1, k2, k3 = jax.random.split(key, 3)
    w1, b1 = linear(k1, input_size, H1)
    w2, b2 = linear(k2, H1, H2)
    w3, b3 = linear(k3, H2, num_classes)
    return (w1, b1, w2, b2, w3, b3)


if __name__ == "__main__":
    key = jax.random.PRNGKey(0)
    kx, kp = jax.random.split(key)

    # Small shapes consistent with the module: B=2, C=4, H=W=16 -> input_size=1024.
    B, C, Hs, Ws = 2, 4, 16, 16
    num_classes = 16
    input_size = C * Hs * Ws

    x = jax.random.normal(kx, (B, C, Hs, Ws), dtype=jnp.float32)
    params = init_params(kp, input_size, num_classes)

    out = simple_classifier(x, params, seed=0)
    out = jax.block_until_ready(out)
    assert out.shape == (B, num_classes)
    assert bool(jnp.all(jnp.isfinite(out)))
    print("KERNEL_OK")
</pallas_src>

<mosaic_0001>
module attributes {stable_mosaic.version = 11 : i64} {
  func.func @classifier_kernel(%arg0: i32, %arg1: memref<8x1024xbf16, #tpu.memory_space<vmem>>, %arg2: memref<8x512xi32, #tpu.memory_space<vmem>>, %arg3: memref<8x256xi32, #tpu.memory_space<vmem>>, %arg4: memref<1024x512xbf16, #tpu.memory_space<vmem>>, %arg5: memref<1x512xf32, #tpu.memory_space<vmem>>, %arg6: memref<512x256xbf16, #tpu.memory_space<vmem>>, %arg7: memref<1x256xf32, #tpu.memory_space<vmem>>, %arg8: memref<256x128xbf16, #tpu.memory_space<vmem>>, %arg9: memref<1x128xf32, #tpu.memory_space<vmem>>, %arg10: memref<8x128xf32, #tpu.memory_space<vmem>>) attributes {dimension_semantics = [#tpu.dimension_semantics<parallel>], iteration_bounds = array<i64: 1>, scalar_prefetch = 0 : i64, scratch_operands = 0 : i64, tpu.core_type = #tpu.core_type<tc>, window_params = [{transform_indices = @transform_0, window_bounds = array<i64: 8, 1024>}, {transform_indices = @transform_1, window_bounds = array<i64: 8, 512>}, {transform_indices = @transform_2, window_bounds = array<i64: 8, 256>}, {pipeline_mode = #tpu.pipeline_mode<synchronous>, transform_indices = @transform_3, window_bounds = array<i64: 1024, 512>}, {pipeline_mode = #tpu.pipeline_mode<synchronous>, transform_indices = @transform_4, window_bounds = array<i64: 1, 512>}, {pipeline_mode = #tpu.pipeline_mode<synchronous>, transform_indices = @transform_5, window_bounds = array<i64: 512, 256>}, {pipeline_mode = #tpu.pipeline_mode<synchronous>, transform_indices = @transform_6, window_bounds = array<i64: 1, 256>}, {pipeline_mode = #tpu.pipeline_mode<synchronous>, transform_indices = @transform_7, window_bounds = array<i64: 256, 128>}, {pipeline_mode = #tpu.pipeline_mode<synchronous>, transform_indices = @transform_8, window_bounds = array<i64: 1, 128>}, {transform_indices = @transform_9, window_bounds = array<i64: 8, 128>}]} {
    %c0 = arith.constant 0 : index
    %c0_0 = arith.constant 0 : index
    %0 = vector.load %arg1[%c0, %c0_0] : memref<8x1024xbf16, #tpu.memory_space<vmem>>, vector<8x1024xbf16>
    %c0_1 = arith.constant 0 : index
    %c0_2 = arith.constant 0 : index
    %1 = vector.load %arg4[%c0_1, %c0_2] : memref<1024x512xbf16, #tpu.memory_space<vmem>>, vector<1024x512xbf16>
    %cst = arith.constant dense<0.000000e+00> : vector<8x512xf32>
    %2 = tpu.matmul %0, %1, %cst {dimension_numbers = #tpu.dot_dimension_numbers<[1], [0], [0], [1], [0, 0, 1, 1], [], []>} : vector<8x1024xbf16>, vector<1024x512xbf16>, vector<8x512xf32> -> vector<8x512xf32>
    %c0_3 = arith.constant 0 : index
    %c0_4 = arith.constant 0 : index
    %3 = vector.load %arg5[%c0_3, %c0_4] : memref<1x512xf32, #tpu.memory_space<vmem>>, vector<1x512xf32>
    %4 = vector.broadcast %3 : vector<1x512xf32> to vector<8x512xf32>
    %5 = arith.addf %2, %4 : vector<8x512xf32>
    %c0_5 = arith.constant 0 : index
    %c0_6 = arith.constant 0 : index
    %6 = vector.load %arg2[%c0_5, %c0_6] : memref<8x512xi32, #tpu.memory_space<vmem>>, vector<8x512xi32>
    %c644245094_i32 = arith.constant 644245094 : i32
    %7 = vector.broadcast %c644245094_i32 : i32 to vector<8x512xi32>
    %8 = arith.cmpi uge, %6, %7 : vector<8x512xi32>
    %cst_7 = arith.constant 0.000000e+00 : f32
    %9 = vector.broadcast %cst_7 : f32 to vector<8x512xf32>
    %10 = arith.cmpf ogt, %5, %9 : vector<8x512xf32>
    %11 = arith.andi %8, %10 : vector<8x512xi1>
    %cst_8 = arith.constant 1.17647064 : f32
    %12 = vector.broadcast %cst_8 : f32 to vector<8x512xf32>
    %13 = arith.mulf %5, %12 : vector<8x512xf32>
    %cst_9 = arith.constant 0.000000e+00 : f32
    %14 = vector.broadcast %cst_9 : f32 to vector<8x512xf32>
    %15 = arith.select %11, %13, %14 : vector<8x512xi1>, vector<8x512xf32>
    %16 = arith.truncf %15 : vector<8x512xf32> to vector<8x512xbf16>
    %c0_10 = arith.constant 0 : index
    %c0_11 = arith.constant 0 : index
    %17 = vector.load %arg6[%c0_10, %c0_11] : memref<512x256xbf16, #tpu.memory_space<vmem>>, vector<512x256xbf16>
    %cst_12 = arith.constant dense<0.000000e+00> : vector<8x256xf32>
    %18 = tpu.matmul %16, %17, %cst_12 {dimension_numbers = #tpu.dot_dimension_numbers<[1], [0], [0], [1], [0, 0, 1, 1], [], []>} : vector<8x512xbf16>, vector<512x256xbf16>, vector<8x256xf32> -> vector<8x256xf32>
    %c0_13 = arith.constant 0 : index
    %c0_14 = arith.constant 0 : index
    %19 = vector.load %arg7[%c0_13, %c0_14] : memref<1x256xf32, #tpu.memory_space<vmem>>, vector<1x256xf32>
    %20 = vector.broadcast %19 : vector<1x256xf32> to vector<8x256xf32>
    %21 = arith.addf %18, %20 : vector<8x256xf32>
    %c0_15 = arith.constant 0 : index
    %c0_16 = arith.constant 0 : index
    %22 = vector.load %arg3[%c0_15, %c0_16] : memref<8x256xi32, #tpu.memory_space<vmem>>, vector<8x256xi32>
    %c644245094_i32_17 = arith.constant 644245094 : i32
    %23 = vector.broadcast %c644245094_i32_17 : i32 to vector<8x256xi32>
    %24 = arith.cmpi uge, %22, %23 : vector<8x256xi32>
    %cst_18 = arith.constant 0.000000e+00 : f32
    %25 = vector.broadcast %cst_18 : f32 to vector<8x256xf32>
    %26 = arith.cmpf ogt, %21, %25 : vector<8x256xf32>
    %27 = arith.andi %24, %26 : vector<8x256xi1>
    %cst_19 = arith.constant 1.17647064 : f32
    %28 = vector.broadcast %cst_19 : f32 to vector<8x256xf32>
    %29 = arith.mulf %21, %28 : vector<8x256xf32>
    %cst_20 = arith.constant 0.000000e+00 : f32
    %30 = vector.broadcast %cst_20 : f32 to vector<8x256xf32>
    %31 = arith.select %27, %29, %30 : vector<8x256xi1>, vector<8x256xf32>
    %32 = arith.truncf %31 : vector<8x256xf32> to vector<8x256xbf16>
    %c0_21 = arith.constant 0 : index
    %c0_22 = arith.constant 0 : index
    %33 = vector.load %arg8[%c0_21, %c0_22] : memref<256x128xbf16, #tpu.memory_space<vmem>>, vector<256x128xbf16>
    %cst_23 = arith.constant dense<0.000000e+00> : vector<8x128xf32>
    %34 = tpu.matmul %32, %33, %cst_23 {dimension_numbers = #tpu.dot_dimension_numbers<[1], [0], [0], [1], [0, 0, 1, 1], [], []>} : vector<8x256xbf16>, vector<256x128xbf16>, vector<8x128xf32> -> vector<8x128xf32>
    %c0_24 = arith.constant 0 : index
    %c0_25 = arith.constant 0 : index
    %35 = vector.load %arg9[%c0_24, %c0_25] : memref<1x128xf32, #tpu.memory_space<vmem>>, vector<1x128xf32>
    %36 = vector.broadcast %35 : vector<1x128xf32> to vector<8x128xf32>
    %37 = arith.addf %34, %36 : vector<8x128xf32>
    %c0_26 = arith.constant 0 : index
    %c0_27 = arith.constant 0 : index
    %38 = vector.load %arg10[%c0_26, %c0_27] : memref<8x128xf32, #tpu.memory_space<vmem>>, vector<8x128xf32>
    tpu.vector_store %arg10[%c0_26, %c0_27], %37 {strides = array<i32>} : memref<8x128xf32, #tpu.memory_space<vmem>>, vector<8x128xf32>,
    return
  }
  func.func @transform_0(%arg0: i32) -> (i32, i32) {
    %c0_i32 = arith.constant 0 : i32
    %c0_i32_0 = arith.constant 0 : i32
    return %arg0, %c0_i32 : i32, i32
  }
  func.func @transform_1(%arg0: i32) -> (i32, i32) {
    %c0_i32 = arith.constant 0 : i32
    %c0_i32_0 = arith.constant 0 : i32
    return %arg0, %c0_i32 : i32, i32
  }
  func.func @transform_2(%arg0: i32) -> (i32, i32) {
    %c0_i32 = arith.constant 0 : i32
    %c0_i32_0 = arith.constant 0 : i32
    return %arg0, %c0_i32 : i32, i32
  }
  func.func @transform_3(%arg0: i32) -> (i32, i32) {
    %c0_i32 = arith.constant 0 : i32
    %c0_i32_0 = arith.constant 0 : i32
    %c0_i32_1 = arith.constant 0 : i32
    return %c0_i32, %c0_i32_0 : i32, i32
  }
  func.func @transform_4(%arg0: i32) -> (i32, i32) {
    %c0_i32 = arith.constant 0 : i32
    %c0_i32_0 = arith.constant 0 : i32
    %c0_i32_1 = arith.constant 0 : i32
    return %c0_i32, %c0_i32_0 : i32, i32
  }
  func.func @transform_5(%arg0: i32) -> (i32, i32) {
    %c0_i32 = arith.constant 0 : i32
    %c0_i32_0 = arith.constant 0 : i32
    %c0_i32_1 = arith.constant 0 : i32
    return %c0_i32, %c0_i32_0 : i32, i32
  }
  func.func @transform_6(%arg0: i32) -> (i32, i32) {
    %c0_i32 = arith.constant 0 : i32
    %c0_i32_0 = arith.constant 0 : i32
    %c0_i32_1 = arith.constant 0 : i32
    return %c0_i32, %c0_i32_0 : i32, i32
  }
  func.func @transform_7(%arg0: i32) -> (i32, i32) {
    %c0_i32 = arith.constant 0 : i32
    %c0_i32_0 = arith.constant 0 : i32
    %c0_i32_1 = arith.constant 0 : i32
    return %c0_i32, %c0_i32_0 : i32, i32
  }
  func.func @transform_8(%arg0: i32) -> (i32, i32) {
    %c0_i32 = arith.constant 0 : i32
    %c0_i32_0 = arith.constant 0 : i32
    %c0_i32_1 = arith.constant 0 : i32
    return %c0_i32, %c0_i32_0 : i32, i32
  }
  func.func @transform_9(%arg0: i32) -> (i32, i32) {
    %c0_i32 = arith.constant 0 : i32
    %c0_i32_0 = arith.constant 0 : i32
    return %arg0, %c0_i32 : i32, i32
  }
}

</mosaic_0001>

<bundles_post_ra>
// kernel: simple_classifier.3
= control target key start
LH: loop header
LB: loop body
LE: loop exit
PB: predicated region body
PF: predicated region fallthrough
CT: control target
= control target key end

     0   :  { %s4716_s3 = inlined_call_operand.vmem [shape: bf16[1024,512], index: 3, kind: input, shape index: {}]   ;;  %s4717_s0 = inlined_call_operand.vmem [shape: bf16[8,1024], index: 0, kind: input, shape index: {}]   ;;  %s4718_s5 = inlined_call_operand.vmem [shape: bf16[512,256], index: 5, kind: input, shape index: {}]   ;;  %s4719_s4 = inlined_call_operand.vmem [shape: f32[1,512], index: 4, kind: input, shape index: {}]   ;;  %s4720_s1 = inlined_call_operand.vmem [shape: u32[8,512], index: 1, kind: input, shape index: {}]   ;;  %s4721_s7 = inlined_call_operand.vmem [shape: bf16[256,128], index: 7, kind: input, shape index: {}]   ;;  %s4722_s6 = inlined_call_operand.vmem [shape: f32[1,256], index: 6, kind: input, shape index: {}]   ;;  %s4723_s2 = inlined_call_operand.vmem [shape: u32[8,256], index: 2, kind: input, shape index: {}]   ;;  %s4724_s8 = inlined_call_operand.vmem [shape: f32[1,128], index: 8, kind: input, shape index: {}]   ;;  %s4725_s9 = inlined_call_operand.vmem [shape: f32[8,128], index: 9, kind: output, shape index: {}]  }
   0x1   :  { %v3036_v0 = vld [vmem:[%s4716_s3 + $0xe4] ss:$16 sps:$4 sm:$0xff]   ;;  %v3040_v2 = vld [vmem:[%s4716_s3 + $0xe0] ss:$16 sps:$4 sm:$0xff]   ;;  %v34_v48 = vld [vmem:[%s4717_s0 + $0x8] sm:$0xff] }
   0x2   :  { %v3038_v1 = vld [vmem:[%s4716_s3 + $0x2e4] ss:$16 sps:$4 sm:$0xff]   ;;  %1623 = vmatprep.subr.bf16.mxu0 %v3036_v0  ;;  %v3041_v3 = vld [vmem:[%s4716_s3 + $0x2e0] ss:$16 sps:$4 sm:$0xff]   ;;  %v3742_v51 = vcombine.high %v34_v48, %v34_v48 }
   0x3   :  { %1664 = vmatprep.subr.bf16.mxu1 %v3038_v1  ;;  %v3042_v4 = vld [vmem:[%s4716_s3 + $0xc4] ss:$16 sps:$4 sm:$0xff]   ;;  %1624 = vmatpush1.bf16.msra.mxu0 %v3040_v2  ;;  %v3046_v6 = vld [vmem:[%s4716_s3 + $0xc0] ss:$16 sps:$4 sm:$0xff]  }
   0x4   :  { %1665 = vmatpush1.bf16.msra.mxu1 %v3041_v3  ;;  %v3044_v5 = vld [vmem:[%s4716_s3 + $0x2c4] ss:$16 sps:$4 sm:$0xff]   ;;  %1625 = vmatprep.subr.bf16.mxu0 %v3042_v4  ;;  %v3047_v7 = vld [vmem:[%s4716_s3 + $0x2c0] ss:$16 sps:$4 sm:$0xff]  }
   0x5   :  { %1666 = vmatprep.subr.bf16.mxu1 %v3044_v5  ;;  %v3048_v8 = vld [vmem:[%s4716_s3 + $0xa4] ss:$16 sps:$4 sm:$0xff]   ;;  %v3052_v10 = vld [vmem:[%s4716_s3 + $0xa0] ss:$16 sps:$4 sm:$0xff]   ;;  %1696 = vmatprep.mubr.bf16.mxu1 %v3742_v51 }
   0x6   :  { %v3050_v9 = vld [vmem:[%s4716_s3 + $0x2a4] ss:$16 sps:$4 sm:$0xff]   ;;  %v3053_v11 = vld [vmem:[%s4716_s3 + $0x2a0] ss:$16 sps:$4 sm:$0xff]  }
   0x7   :  { %1626 = vmatpush1.bf16.msra.mxu0 %v3046_v6  ;;  %v3054_v12 = vld [vmem:[%s4716_s3 + $0x84] ss:$16 sps:$4 sm:$0xff]   ;;  %v3058_v14 = vld [vmem:[%s4716_s3 + $0x80] ss:$16 sps:$4 sm:$0xff]  }
   0x8   :  { %1667 = vmatpush1.bf16.msra.mxu1 %v3047_v7  ;;  %1627 = vmatprep.subr.bf16.mxu0 %v3048_v8  ;;  %v3056_v13 = vld [vmem:[%s4716_s3 + $0x284] ss:$16 sps:$4 sm:$0xff]   ;;  %v3059_v15 = vld [vmem:[%s4716_s3 + $0x280] ss:$16 sps:$4 sm:$0xff]   ;;  %v3802_v7 = vcombine.low %v34_v48, %v34_v48 }
   0x9   :  { %1668 = vmatprep.subr.bf16.mxu1 %v3050_v9  ;;  %v3060_v16 = vld [vmem:[%s4716_s3 + $0x64] ss:$16 sps:$4 sm:$0xff]   ;;  %v3064_v18 = vld [vmem:[%s4716_s3 + $0x60] ss:$16 sps:$4 sm:$0xff]  }
   0xa   :  { %v3062_v17 = vld [vmem:[%s4716_s3 + $0x264] ss:$16 sps:$4 sm:$0xff]   ;;  %v3065_v19 = vld [vmem:[%s4716_s3 + $0x260] ss:$16 sps:$4 sm:$0xff]  }
   0xb   :  { %1628 = vmatpush1.bf16.msra.mxu0 %v3052_v10  ;;  %v3066_v20 = vld [vmem:[%s4716_s3 + $0x44] ss:$16 sps:$4 sm:$0xff]   ;;  %v3070_v22 = vld [vmem:[%s4716_s3 + $0x40] ss:$16 sps:$4 sm:$0xff]  }
   0xc   :  { %1669 = vmatpush1.bf16.msra.mxu1 %v3053_v11  ;;  %1629 = vmatprep.subr.bf16.mxu0 %v3054_v12  ;;  %v3068_v21 = vld [vmem:[%s4716_s3 + $0x244] ss:$16 sps:$4 sm:$0xff]   ;;  %v3071_v23 = vld [vmem:[%s4716_s3 + $0x240] ss:$16 sps:$4 sm:$0xff]  }
   0xd   :  { %1670 = vmatprep.subr.bf16.mxu1 %v3056_v13  ;;  %v3072_v24 = vld [vmem:[%s4716_s3 + $0x24] ss:$16 sps:$4 sm:$0xff]   ;;  %v3076_v26 = vld [vmem:[%s4716_s3 + $0x20] ss:$16 sps:$4 sm:$0xff]  }
   0xe   :  { %v3074_v25 = vld [vmem:[%s4716_s3 + $0x224] ss:$16 sps:$4 sm:$0xff]   ;;  %v3077_v27 = vld [vmem:[%s4716_s3 + $0x220] ss:$16 sps:$4 sm:$0xff]  }
   0xf   :  { %1630 = vmatpush1.bf16.msra.mxu0 %v3058_v14  ;;  %v3078_v28 = vld [vmem:[%s4716_s3 + $0x4] ss:$16 sps:$4 sm:$0xff]   ;;  %v3082_v30 = vld [vmem:[%s4716_s3] ss:$16 sps:$4 sm:$0xff]  }
  0x10   :  { %1671 = vmatpush1.bf16.msra.mxu1 %v3059_v15  ;;  %1631 = vmatprep.subr.bf16.mxu0 %v3060_v16  ;;  %v3080_v29 = vld [vmem:[%s4716_s3 + $0x204] ss:$16 sps:$4 sm:$0xff]   ;;  %v3083_v31 = vld [vmem:[%s4716_s3 + $0x200] ss:$16 sps:$4 sm:$0xff]  }
  0x11   :  { %1672 = vmatprep.subr.bf16.mxu1 %v3062_v17  ;;  %v3084_v32 = vld [vmem:[%s4716_s3 + $0x1e4] ss:$16 sps:$4 sm:$0xff]   ;;  %v3088_v34 = vld [vmem:[%s4716_s3 + $0x1e0] ss:$16 sps:$4 sm:$0xff]  }
  0x12   :  { %v3086_v33 = vld [vmem:[%s4716_s3 + $0x3e4] ss:$16 sps:$4 sm:$0xff]   ;;  %v3089_v35 = vld [vmem:[%s4716_s3 + $0x3e0] ss:$16 sps:$4 sm:$0xff]  }
  0x13   :  { %1632 = vmatpush1.bf16.msra.mxu0 %v3064_v18  ;;  %v3090_v36 = vld [vmem:[%s4716_s3 + $0x1c4] ss:$16 sps:$4 sm:$0xff]   ;;  %v3094_v38 = vld [vmem:[%s4716_s3 + $0x1c0] ss:$16 sps:$4 sm:$0xff]  }
  0x14   :  { %1673 = vmatpush1.bf16.msra.mxu1 %v3065_v19  ;;  %1633 = vmatprep.subr.bf16.mxu0 %v3066_v20  ;;  %v3092_v37 = vld [vmem:[%s4716_s3 + $0x3c4] ss:$16 sps:$4 sm:$0xff]   ;;  %v3095_v39 = vld [vmem:[%s4716_s3 + $0x3c0] ss:$16 sps:$4 sm:$0xff]  }
  0x15   :  { %1674 = vmatprep.subr.bf16.mxu1 %v3068_v21  ;;  %v3096_v40 = vld [vmem:[%s4716_s3 + $0x1a4] ss:$16 sps:$4 sm:$0xff]   ;;  %v3100_v42 = vld [vmem:[%s4716_s3 + $0x1a0] ss:$16 sps:$4 sm:$0xff]  }
  0x16   :  { %v3098_v41 = vld [vmem:[%s4716_s3 + $0x3a4] ss:$16 sps:$4 sm:$0xff]   ;;  %v3101_v43 = vld [vmem:[%s4716_s3 + $0x3a0] ss:$16 sps:$4 sm:$0xff]  }
  0x17   :  { %1634 = vmatpush1.bf16.msra.mxu0 %v3070_v22  ;;  %v3102_v44 = vld [vmem:[%s4716_s3 + $0x184] ss:$16 sps:$4 sm:$0xff]   ;;  %v3106_v49 = vld [vmem:[%s4716_s3 + $0x180] ss:$16 sps:$4 sm:$0xff]  }
  0x18   :  { %1675 = vmatpush1.bf16.msra.mxu1 %v3071_v23  ;;  %1635 = vmatprep.subr.bf16.mxu0 %v3072_v24  ;;  %v3104_v45 = vld [vmem:[%s4716_s3 + $0x384] ss:$16 sps:$4 sm:$0xff]   ;;  %v3107_v50 = vld [vmem:[%s4716_s3 + $0x380] ss:$16 sps:$4 sm:$0xff]  }
  0x19   :  { %1676 = vmatprep.subr.bf16.mxu1 %v3074_v25  ;;  %v33_v46 = vld [vmem:[%s4717_s0] sm:$0xff] }
  0x1a   :  { %v3731_v47 = vcombine.high %v33_v46, %v33_v46  ;;  %v3108_v52 = vld [vmem:[%s4716_s3 + $0x164] ss:$16 sps:$4 sm:$0xff]   ;;  %v3112_v54 = vld [vmem:[%s4716_s3 + $0x160] ss:$16 sps:$4 sm:$0xff]   ;;  %v3800_v6 = vcombine.low %v33_v46, %v33_v46 }
  0x1b   :  { %1636 = vmatpush1.bf16.msra.mxu0 %v3076_v26  ;;  %v3110_v53 = vld [vmem:[%s4716_s3 + $0x364] ss:$16 sps:$4 sm:$0xff]   ;;  %v3113_v55 = vld [vmem:[%s4716_s3 + $0x360] ss:$16 sps:$4 sm:$0xff]  }
  0x1c   :  { %1677 = vmatpush1.bf16.msra.mxu1 %v3077_v27  ;;  %1637 = vmatprep.subr.bf16.mxu0 %v3078_v28  ;;  %v3114_v56 = vld [vmem:[%s4716_s3 + $0x144] ss:$16 sps:$4 sm:$0xff]   ;;  %v3118_v58 = vld [vmem:[%s4716_s3 + $0x140] ss:$16 sps:$4 sm:$0xff]  }
  0x1d   :  { %1678 = vmatprep.subr.bf16.mxu1 %v3080_v29  ;;  %1655 = vmatprep.mubr.bf16.mxu0 %v3731_v47  ;;  %v3116_v57 = vld [vmem:[%s4716_s3 + $0x344] ss:$16 sps:$4 sm:$0xff]   ;;  %v3119_v59 = vld [vmem:[%s4716_s3 + $0x340] ss:$16 sps:$4 sm:$0xff]  }
  0x1e   :  { %v3120_v60 = vld [vmem:[%s4716_s3 + $0x124] ss:$16 sps:$4 sm:$0xff]   ;;  %v3124_v62 = vld [vmem:[%s4716_s3 + $0x120] ss:$16 sps:$4 sm:$0xff]  }
  0x1f   :  { %1638 = vmatpush1.bf16.msra.mxu0 %v3082_v30  ;;  %v3122_v61 = vld [vmem:[%s4716_s3 + $0x324] ss:$16 sps:$4 sm:$0xff]   ;;  %v3125_v63 = vld [vmem:[%s4716_s3 + $0x320] ss:$16 sps:$4 sm:$0xff]  }
  0x20   :  { %1679 = vmatpush1.bf16.msra.mxu1 %v3083_v31  ;;  %1639 = vmatprep.subr.bf16.mxu0 %v3084_v32  ;;  %v3126_v0 = vld [vmem:[%s4716_s3 + $0x104] ss:$16 sps:$4 sm:$0xff]   ;;  %v3130_v2 = vld [vmem:[%s4716_s3 + $0x100] ss:$16 sps:$4 sm:$0xff]  }
  0x21   :  { %1680 = vmatprep.subr.bf16.mxu1 %v3086_v33  ;;  %v3128_v1 = vld [vmem:[%s4716_s3 + $0x304] ss:$16 sps:$4 sm:$0xff]   ;;  %v3131_v3 = vld [vmem:[%s4716_s3 + $0x300] ss:$16 sps:$4 sm:$0xff]   ;;  %v3886_v33 = vld [vmem:[%s4717_s0 + $0x18] sm:$0xff] }
  0x22   :  { %v3138_v4 = vld [vmem:[%s4716_s3 + $0x4e4] ss:$16 sps:$4 sm:$0xff]   ;;  %v3136_v8 = vld [vmem:[%s4716_s3 + $0x4e0] ss:$16 sps:$4 sm:$0xff]  }
  0x23   :  { %1640 = vmatpush2.bf16.msra.mxu0 %v3088_v34  ;;  %v3141_v5 = vld [vmem:[%s4716_s3 + $0x6e4] ss:$16 sps:$4 sm:$0xff]   ;;  %v3139_v9 = vld [vmem:[%s4716_s3 + $0x6e0] ss:$16 sps:$4 sm:$0xff]  }
  0x24   :  { %1681 = vmatpush2.bf16.msra.mxu1 %v3089_v35  ;;  %1641 = vmatprep.subr.bf16.mxu0 %v3090_v36  ;;  %v3144_v10 = vld [vmem:[%s4716_s3 + $0x4c4] ss:$16 sps:$4 sm:$0xff]   ;;  %v3142_v12 = vld [vmem:[%s4716_s3 + $0x4c0] ss:$16 sps:$4 sm:$0xff]  }
  0x25   :  { %1682 = vmatprep.subr.bf16.mxu1 %v3092_v37  ;;  %v3147_v11 = vld [vmem:[%s4716_s3 + $0x6c4] ss:$16 sps:$4 sm:$0xff]   ;;  %v3145_v13 = vld [vmem:[%s4716_s3 + $0x6c0] ss:$16 sps:$4 sm:$0xff]   ;;  %v3900_v37 = vcombine.high %v3886_v33, %v3886_v33 }
  0x26   :  { %v3150_v14 = vld [vmem:[%s4716_s3 + $0x4a4] ss:$16 sps:$4 sm:$0xff]   ;;  %v3148_v16 = vld [vmem:[%s4716_s3 + $0x4a0] ss:$16 sps:$4 sm:$0xff]  }
  0x27   :  { %1642 = vmatpush2.bf16.msra.mxu0 %v3094_v38  ;;  %v3153_v15 = vld [vmem:[%s4716_s3 + $0x6a4] ss:$16 sps:$4 sm:$0xff]   ;;  %v3151_v17 = vld [vmem:[%s4716_s3 + $0x6a0] ss:$16 sps:$4 sm:$0xff]  }
  0x28   :  { %1683 = vmatpush2.bf16.msra.mxu1 %v3095_v39  ;;  %1643 = vmatprep.subr.bf16.mxu0 %v3096_v40  ;;  %v3156_v18 = vld [vmem:[%s4716_s3 + $0x484] ss:$16 sps:$4 sm:$0xff]   ;;  %v3154_v20 = vld [vmem:[%s4716_s3 + $0x480] ss:$16 sps:$4 sm:$0xff]  }
  0x29   :  { %1684 = vmatprep.subr.bf16.mxu1 %v3098_v41  ;;  %v3159_v19 = vld [vmem:[%s4716_s3 + $0x684] ss:$16 sps:$4 sm:$0xff]   ;;  %v3157_v21 = vld [vmem:[%s4716_s3 + $0x680] ss:$16 sps:$4 sm:$0xff]  }
  0x2a   :  { %v3162_v22 = vld [vmem:[%s4716_s3 + $0x464] ss:$16 sps:$4 sm:$0xff]   ;;  %v3160_v24 = vld [vmem:[%s4716_s3 + $0x460] ss:$16 sps:$4 sm:$0xff]  }
  0x2b   :  { %1644 = vmatpush2.bf16.msra.mxu0 %v3100_v42  ;;  %v3165_v23 = vld [vmem:[%s4716_s3 + $0x664] ss:$16 sps:$4 sm:$0xff]   ;;  %v3163_v25 = vld [vmem:[%s4716_s3 + $0x660] ss:$16 sps:$4 sm:$0xff]  }
  0x2c   :  { %1685 = vmatpush2.bf16.msra.mxu1 %v3101_v43  ;;  %1645 = vmatprep.subr.bf16.mxu0 %v3102_v44  ;;  %v3168_v26 = vld [vmem:[%s4716_s3 + $0x444] ss:$16 sps:$4 sm:$0xff]   ;;  %v3166_v28 = vld [vmem:[%s4716_s3 + $0x440] ss:$16 sps:$4 sm:$0xff]  }
  0x2d   :  { %1686 = vmatprep.subr.bf16.mxu1 %v3104_v45  ;;  %v3171_v27 = vld [vmem:[%s4716_s3 + $0x644] ss:$16 sps:$4 sm:$0xff]   ;;  %v3169_v29 = vld [vmem:[%s4716_s3 + $0x640] ss:$16 sps:$4 sm:$0xff]  }
  0x2e   :  { %v3174_v30 = vld [vmem:[%s4716_s3 + $0x424] ss:$16 sps:$4 sm:$0xff]   ;;  %v3172_v34 = vld [vmem:[%s4716_s3 + $0x420] ss:$16 sps:$4 sm:$0xff]  }
  0x2f   :  { %1646 = vmatpush2.bf16.msra.mxu0 %v3106_v49  ;;  %v3177_v31 = vld [vmem:[%s4716_s3 + $0x624] ss:$16 sps:$4 sm:$0xff]   ;;  %v3175_v35 = vld [vmem:[%s4716_s3 + $0x620] ss:$16 sps:$4 sm:$0xff]  }
  0x30   :  { %1687 = vmatpush2.bf16.msra.mxu1 %v3107_v50  ;;  %1647 = vmatprep.subr.bf16.mxu0 %v3108_v52  ;;  %v3881_v32 = vld [vmem:[%s4717_s0 + $0x10] sm:$0xff] }
  0x31   :  { %1688 = vmatprep.subr.bf16.mxu1 %v3110_v53  ;;  %v3896_v36 = vcombine.high %v3881_v32, %v3881_v32  ;;  %v3180_v38 = vld [vmem:[%s4716_s3 + $0x404] ss:$16 sps:$4 sm:$0xff]   ;;  %v3178_v40 = vld [vmem:[%s4716_s3 + $0x400] ss:$16 sps:$4 sm:$0xff]  }
  0x32   :  { %v3183_v39 = vld [vmem:[%s4716_s3 + $0x604] ss:$16 sps:$4 sm:$0xff]   ;;  %v3181_v41 = vld [vmem:[%s4716_s3 + $0x600] ss:$16 sps:$4 sm:$0xff]  }
  0x33   :  { %1648 = vmatpush2.bf16.msra.mxu0 %v3112_v54  ;;  %v3186_v42 = vld [vmem:[%s4716_s3 + $0x5e4] ss:$16 sps:$4 sm:$0xff]   ;;  %v3184_v44 = vld [vmem:[%s4716_s3 + $0x5e0] ss:$16 sps:$4 sm:$0xff]  }
  0x34   :  { %1689 = vmatpush2.bf16.msra.mxu1 %v3113_v55  ;;  %1649 = vmatprep.subr.bf16.mxu0 %v3114_v56  ;;  %v3189_v43 = vld [vmem:[%s4716_s3 + $0x7e4] ss:$16 sps:$4 sm:$0xff]   ;;  %v3187_v45 = vld [vmem:[%s4716_s3 + $0x7e0] ss:$16 sps:$4 sm:$0xff]  }
  0x35   :  { %1690 = vmatprep.subr.bf16.mxu1 %v3116_v57  ;;  %v3192_v46 = vld [vmem:[%s4716_s3 + $0x5c4] ss:$16 sps:$4 sm:$0xff]   ;;  %v3190_v49 = vld [vmem:[%s4716_s3 + $0x5c0] ss:$16 sps:$4 sm:$0xff]  }
  0x36   :  { %v3195_v48 = vld [vmem:[%s4716_s3 + $0x7c4] ss:$16 sps:$4 sm:$0xff]   ;;  %v3193_v50 = vld [vmem:[%s4716_s3 + $0x7c0] ss:$16 sps:$4 sm:$0xff]  }
  0x37   :  { %1650 = vmatpush2.bf16.msra.mxu0 %v3118_v58  ;;  %v3198_v52 = vld [vmem:[%s4716_s3 + $0x5a4] ss:$16 sps:$4 sm:$0xff]   ;;  %v3196_v54 = vld [vmem:[%s4716_s3 + $0x5a0] ss:$16 sps:$4 sm:$0xff]  }
  0x38   :  { %1691 = vmatpush2.bf16.msra.mxu1 %v3119_v59  ;;  %1651 = vmatprep.subr.bf16.mxu0 %v3120_v60  ;;  %v3201_v53 = vld [vmem:[%s4716_s3 + $0x7a4] ss:$16 sps:$4 sm:$0xff]   ;;  %v3199_v55 = vld [vmem:[%s4716_s3 + $0x7a0] ss:$16 sps:$4 sm:$0xff]  }
  0x39   :  { %1692 = vmatprep.subr.bf16.mxu1 %v3122_v61  ;;  %v3204_v56 = vld [vmem:[%s4716_s3 + $0x584] ss:$16 sps:$4 sm:$0xff]   ;;  %v3202_v58 = vld [vmem:[%s4716_s3 + $0x580] ss:$16 sps:$4 sm:$0xff]  }
  0x3a   :  { %v3207_v57 = vld [vmem:[%s4716_s3 + $0x784] ss:$16 sps:$4 sm:$0xff]   ;;  %v3205_v59 = vld [vmem:[%s4716_s3 + $0x780] ss:$16 sps:$4 sm:$0xff]  }
  0x3b   :  { %1652 = vmatpush2.bf16.msra.mxu0 %v3124_v62  ;;  %v3210_v60 = vld [vmem:[%s4716_s3 + $0x564] ss:$16 sps:$4 sm:$0xff]   ;;  %v3208_v62 = vld [vmem:[%s4716_s3 + $0x560] ss:$16 sps:$4 sm:$0xff]  }
  0x3c   :  { %1693 = vmatpush2.bf16.msra.mxu1 %v3125_v63  ;;  %1653 = vmatprep.subr.bf16.mxu0 %v3126_v0  ;;  %v3213_v61 = vld [vmem:[%s4716_s3 + $0x764] ss:$16 sps:$4 sm:$0xff]   ;;  %v3211_v63 = vld [vmem:[%s4716_s3 + $0x760] ss:$16 sps:$4 sm:$0xff]  }
  0x3d   :  { %1694 = vmatprep.subr.bf16.mxu1 %v3128_v1  ;;  %v3216_v0 = vld [vmem:[%s4716_s3 + $0x544] ss:$16 sps:$4 sm:$0xff]  }
  0x3e   :  { %v3219_v1 = vld [vmem:[%s4716_s3 + $0x744] ss:$16 sps:$4 sm:$0xff]  }
  0x3f   :  { %1654 = vmatpush2.bf16.msra.mxu0 %v3130_v2  ;;  %v3214_v2 = vld [vmem:[%s4716_s3 + $0x540] ss:$16 sps:$4 sm:$0xff]  }
  0x40   :  { %1695 = vmatpush2.bf16.msra.mxu1 %v3131_v3  ;;  %1705 = vmatprep.subr.bf16.mxu0 %v3138_v4  ;;  %v3217_v3 = vld [vmem:[%s4716_s3 + $0x740] ss:$16 sps:$4 sm:$0xff]   ;;  %v3222_v4 = vld [vmem:[%s4716_s3 + $0x524] ss:$16 sps:$4 sm:$0xff]  }
  0x41   :  { %1746 = vmatprep.subr.bf16.mxu1 %v3141_v5  ;;  %v3225_v5 = vld [vmem:[%s4716_s3 + $0x724] ss:$16 sps:$4 sm:$0xff]  }
  0x42   :  { %1656 = vmatmul.mubr.bf16.vlgmr.msra.gmra.mxu0 %v3800_v6 }
  0x43   :  { %1697 = vmatmul.mubr.bf16.vlgmr.msra.gmra.mxu1 %v3802_v7  ;;  %1706 = vmatpush1.bf16.msra.mxu0 %v3136_v8  ;;  %v3220_v8 = vld [vmem:[%s4716_s3 + $0x520] ss:$16 sps:$4 sm:$0xff]  }
  0x44   :  { %1747 = vmatpush1.bf16.msra.mxu1 %v3139_v9  ;;  %1707 = vmatprep.subr.bf16.mxu0 %v3144_v10  ;;  %v3223_v9 = vld [vmem:[%s4716_s3 + $0x720] ss:$16 sps:$4 sm:$0xff]   ;;  %v3228_v10 = vld [vmem:[%s4716_s3 + $0x504] ss:$16 sps:$4 sm:$0xff]  }
  0x45   :  { %1748 = vmatprep.subr.bf16.mxu1 %v3147_v11  ;;  %1737 = vmatprep.mubr.bf16.mxu0 %v3896_v36  ;;  %v3231_v11 = vld [vmem:[%s4716_s3 + $0x704] ss:$16 sps:$4 sm:$0xff]  }
  0x46   :  { %1778 = vmatprep.mubr.bf16.mxu1 %v3900_v37 }
  0x47   :  { %1708 = vmatpush1.bf16.msra.mxu0 %v3142_v12  ;;  %v3226_v12 = vld [vmem:[%s4716_s3 + $0x500] ss:$16 sps:$4 sm:$0xff]  }
  0x48   :  { %1749 = vmatpush1.bf16.msra.mxu1 %v3145_v13  ;;  %1709 = vmatprep.subr.bf16.mxu0 %v3150_v14  ;;  %v3229_v13 = vld [vmem:[%s4716_s3 + $0x700] ss:$16 sps:$4 sm:$0xff]   ;;  %v3238_v14 = vld [vmem:[%s4716_s3 + $0xec] ss:$16 sps:$4 sm:$0xff]  }
  0x49   :  { %1750 = vmatprep.subr.bf16.mxu1 %v3153_v15  ;;  %v3241_v15 = vld [vmem:[%s4716_s3 + $0x2ec] ss:$16 sps:$4 sm:$0xff]  }
  0x4b   :  { %1710 = vmatpush1.bf16.msra.mxu0 %v3148_v16  ;;  %v4020_v16 = vcombine.low %v3881_v32, %v3881_v32  ;;  %v3260_v32 = vld [vmem:[%s4716_s3 + $0x68] ss:$16 sps:$4 sm:$0xff]  }
  0x4c   :  { %1751 = vmatpush1.bf16.msra.mxu1 %v3151_v17  ;;  %1711 = vmatprep.subr.bf16.mxu0 %v3156_v18  ;;  %v4024_v17 = vcombine.low %v3886_v33, %v3886_v33  ;;  %v3236_v18 = vld [vmem:[%s4716_s3 + $0xe8] ss:$16 sps:$4 sm:$0xff]  }
  0x4d   :  { %1752 = vmatprep.subr.bf16.mxu1 %v3159_v19  ;;  %v3239_v19 = vld [vmem:[%s4716_s3 + $0x2e8] ss:$16 sps:$4 sm:$0xff]  }
  0x4e   :  { %v3263_v33 = vld [vmem:[%s4716_s3 + $0x268] ss:$16 sps:$4 sm:$0xff]  }
  0x4f   :  { %1712 = vmatpush1.bf16.msra.mxu0 %v3154_v20  ;;  %v3244_v20 = vld [vmem:[%s4716_s3 + $0xcc] ss:$16 sps:$4 sm:$0xff]  }
  0x50   :  { %1753 = vmatpush1.bf16.msra.mxu1 %v3157_v21  ;;  %1713 = vmatprep.subr.bf16.mxu0 %v3162_v22  ;;  %v3247_v21 = vld [vmem:[%s4716_s3 + $0x2cc] ss:$16 sps:$4 sm:$0xff]   ;;  %v3242_v22 = vld [vmem:[%s4716_s3 + $0xc8] ss:$16 sps:$4 sm:$0xff]  }
  0x51   :  { %1754 = vmatprep.subr.bf16.mxu1 %v3165_v23  ;;  %v3245_v23 = vld [vmem:[%s4716_s3 + $0x2c8] ss:$16 sps:$4 sm:$0xff]  }
  0x53   :  { %1714 = vmatpush1.bf16.msra.mxu0 %v3160_v24  ;;  %v3250_v24 = vld [vmem:[%s4716_s3 + $0xac] ss:$16 sps:$4 sm:$0xff]  }
  0x54   :  { %1755 = vmatpush1.bf16.msra.mxu1 %v3163_v25  ;;  %1715 = vmatprep.subr.bf16.mxu0 %v3168_v26  ;;  %v3253_v25 = vld [vmem:[%s4716_s3 + $0x2ac] ss:$16 sps:$4 sm:$0xff]   ;;  %v3248_v26 = vld [vmem:[%s4716_s3 + $0xa8] ss:$16 sps:$4 sm:$0xff]  }
  0x55   :  { %1756 = vmatprep.subr.bf16.mxu1 %v3171_v27  ;;  %v3251_v27 = vld [vmem:[%s4716_s3 + $0x2a8] ss:$16 sps:$4 sm:$0xff]  }
  0x57   :  { %1716 = vmatpush1.bf16.msra.mxu0 %v3166_v28  ;;  %v3256_v28 = vld [vmem:[%s4716_s3 + $0x8c] ss:$16 sps:$4 sm:$0xff]  }
  0x58   :  { %1757 = vmatpush1.bf16.msra.mxu1 %v3169_v29  ;;  %1717 = vmatprep.subr.bf16.mxu0 %v3174_v30  ;;  %v3257_v29 = vld [vmem:[%s4716_s3 + $0x288] ss:$16 sps:$4 sm:$0xff]   ;;  %v3262_v30 = vld [vmem:[%s4716_s3 + $0x6c] ss:$16 sps:$4 sm:$0xff]  }
  0x59   :  { %1758 = vmatprep.subr.bf16.mxu1 %v3177_v31  ;;  %v3265_v31 = vld [vmem:[%s4716_s3 + $0x26c] ss:$16 sps:$4 sm:$0xff]  }
  0x5b   :  { %1718 = vmatpush1.bf16.msra.mxu0 %v3172_v34  ;;  %v3268_v34 = vld [vmem:[%s4716_s3 + $0x4c] ss:$16 sps:$4 sm:$0xff]  }
  0x5c   :  { %1759 = vmatpush1.bf16.msra.mxu1 %v3175_v35  ;;  %1719 = vmatprep.subr.bf16.mxu0 %v3180_v38  ;;  %v3271_v35 = vld [vmem:[%s4716_s3 + $0x24c] ss:$16 sps:$4 sm:$0xff]   ;;  %v3266_v38 = vld [vmem:[%s4716_s3 + $0x48] ss:$16 sps:$4 sm:$0xff]  }
  0x5d   :  { %1760 = vmatprep.subr.bf16.mxu1 %v3183_v39  ;;  %v3269_v39 = vld [vmem:[%s4716_s3 + $0x248] ss:$16 sps:$4 sm:$0xff]  }
  0x5f   :  { %1720 = vmatpush1.bf16.msra.mxu0 %v3178_v40  ;;  %v3274_v40 = vld [vmem:[%s4716_s3 + $0x2c] ss:$16 sps:$4 sm:$0xff]  }
  0x60   :  { %1761 = vmatpush1.bf16.msra.mxu1 %v3181_v41  ;;  %1721 = vmatprep.subr.bf16.mxu0 %v3186_v42  ;;  %v3277_v41 = vld [vmem:[%s4716_s3 + $0x22c] ss:$16 sps:$4 sm:$0xff]   ;;  %v3272_v42 = vld [vmem:[%s4716_s3 + $0x28] ss:$16 sps:$4 sm:$0xff]  }
  0x61   :  { %1762 = vmatprep.subr.bf16.mxu1 %v3189_v43  ;;  %v3275_v43 = vld [vmem:[%s4716_s3 + $0x228] ss:$16 sps:$4 sm:$0xff]  }
  0x63   :  { %1722 = vmatpush2.bf16.msra.mxu0 %v3184_v44  ;;  %v3280_v44 = vld [vmem:[%s4716_s3 + $0xc] ss:$16 sps:$4 sm:$0xff]  }
  0x64   :  { %1763 = vmatpush2.bf16.msra.mxu1 %v3187_v45  ;;  %1723 = vmatprep.subr.bf16.mxu0 %v3192_v46  ;;  %v3283_v45 = vld [vmem:[%s4716_s3 + $0x20c] ss:$16 sps:$4 sm:$0xff]   ;;  %v3278_v46 = vld [vmem:[%s4716_s3 + $0x8] ss:$16 sps:$4 sm:$0xff]  }
  0x65   :  { %1764 = vmatprep.subr.bf16.mxu1 %v3195_v48  ;;  %v3281_v48 = vld [vmem:[%s4716_s3 + $0x208] ss:$16 sps:$4 sm:$0xff]  }
  0x67   :  { %1724 = vmatpush2.bf16.msra.mxu0 %v3190_v49  ;;  %v3286_v49 = vld [vmem:[%s4716_s3 + $0x1ec] ss:$16 sps:$4 sm:$0xff]  }
  0x68   :  { %1765 = vmatpush2.bf16.msra.mxu1 %v3193_v50  ;;  %1725 = vmatprep.subr.bf16.mxu0 %v3198_v52  ;;  %v3289_v50 = vld [vmem:[%s4716_s3 + $0x3ec] ss:$16 sps:$4 sm:$0xff]   ;;  %v3284_v52 = vld [vmem:[%s4716_s3 + $0x1e8] ss:$16 sps:$4 sm:$0xff]  }
  0x69   :  { %1766 = vmatprep.subr.bf16.mxu1 %v3201_v53  ;;  %v3287_v53 = vld [vmem:[%s4716_s3 + $0x3e8] ss:$16 sps:$4 sm:$0xff]  }
  0x6b   :  { %1726 = vmatpush2.bf16.msra.mxu0 %v3196_v54  ;;  %v3292_v54 = vld [vmem:[%s4716_s3 + $0x1cc] ss:$16 sps:$4 sm:$0xff]  }
  0x6c   :  { %1767 = vmatpush2.bf16.msra.mxu1 %v3199_v55  ;;  %1727 = vmatprep.subr.bf16.mxu0 %v3204_v56  ;;  %v3295_v55 = vld [vmem:[%s4716_s3 + $0x3cc] ss:$16 sps:$4 sm:$0xff]   ;;  %v3290_v56 = vld [vmem:[%s4716_s3 + $0x1c8] ss:$16 sps:$4 sm:$0xff]  }
  0x6d   :  { %1768 = vmatprep.subr.bf16.mxu1 %v3207_v57  ;;  %v3293_v57 = vld [vmem:[%s4716_s3 + $0x3c8] ss:$16 sps:$4 sm:$0xff]  }
  0x6f   :  { %1728 = vmatpush2.bf16.msra.mxu0 %v3202_v58  ;;  %v3298_v58 = vld [vmem:[%s4716_s3 + $0x1ac] ss:$16 sps:$4 sm:$0xff]  }
  0x70   :  { %1769 = vmatpush2.bf16.msra.mxu1 %v3205_v59  ;;  %1729 = vmatprep.subr.bf16.mxu0 %v3210_v60  ;;  %v3301_v59 = vld [vmem:[%s4716_s3 + $0x3ac] ss:$16 sps:$4 sm:$0xff]   ;;  %v3296_v60 = vld [vmem:[%s4716_s3 + $0x1a8] ss:$16 sps:$4 sm:$0xff]  }
  0x71   :  { %1770 = vmatprep.subr.bf16.mxu1 %v3213_v61  ;;  %v3299_v61 = vld [vmem:[%s4716_s3 + $0x3a8] ss:$16 sps:$4 sm:$0xff]  }
  0x73   :  { %1730 = vmatpush2.bf16.msra.mxu0 %v3208_v62  ;;  %v3304_v62 = vld [vmem:[%s4716_s3 + $0x18c] ss:$16 sps:$4 sm:$0xff]  }
  0x74   :  { %1771 = vmatpush2.bf16.msra.mxu1 %v3211_v63  ;;  %1731 = vmatprep.subr.bf16.mxu0 %v3216_v0  ;;  %v3307_v63 = vld [vmem:[%s4716_s3 + $0x38c] ss:$16 sps:$4 sm:$0xff]   ;;  %v3302_v0 = vld [vmem:[%s4716_s3 + $0x188] ss:$16 sps:$4 sm:$0xff]  }
  0x75   :  { %1772 = vmatprep.subr.bf16.mxu1 %v3219_v1  ;;  %v3305_v1 = vld [vmem:[%s4716_s3 + $0x388] ss:$16 sps:$4 sm:$0xff]  }
  0x77   :  { %1732 = vmatpush2.bf16.msra.mxu0 %v3214_v2  ;;  %v3310_v2 = vld [vmem:[%s4716_s3 + $0x16c] ss:$16 sps:$4 sm:$0xff]  }
  0x78   :  { %1773 = vmatpush2.bf16.msra.mxu1 %v3217_v3  ;;  %1733 = vmatprep.subr.bf16.mxu0 %v3222_v4  ;;  %v3313_v3 = vld [vmem:[%s4716_s3 + $0x36c] ss:$16 sps:$4 sm:$0xff]   ;;  %v3308_v4 = vld [vmem:[%s4716_s3 + $0x168] ss:$16 sps:$4 sm:$0xff]  }
  0x79   :  { %1774 = vmatprep.subr.bf16.mxu1 %v3225_v5  ;;  %v3311_v5 = vld [vmem:[%s4716_s3 + $0x368] ss:$16 sps:$4 sm:$0xff]  }
  0x7b   :  { %1734 = vmatpush2.bf16.msra.mxu0 %v3220_v8  ;;  %v3316_v8 = vld [vmem:[%s4716_s3 + $0x14c] ss:$16 sps:$4 sm:$0xff]  }
  0x7c   :  { %1775 = vmatpush2.bf16.msra.mxu1 %v3223_v9  ;;  %1735 = vmatprep.subr.bf16.mxu0 %v3228_v10  ;;  %v3319_v9 = vld [vmem:[%s4716_s3 + $0x34c] ss:$16 sps:$4 sm:$0xff]   ;;  %v3314_v10 = vld [vmem:[%s4716_s3 + $0x148] ss:$16 sps:$4 sm:$0xff]  }
  0x7d   :  { %1776 = vmatprep.subr.bf16.mxu1 %v3231_v11  ;;  %v3317_v11 = vld [vmem:[%s4716_s3 + $0x348] ss:$16 sps:$4 sm:$0xff]  }
  0x7f   :  { %1736 = vmatpush2.bf16.msra.mxu0 %v3226_v12  ;;  %v3322_v12 = vld [vmem:[%s4716_s3 + $0x12c] ss:$16 sps:$4 sm:$0xff]  }
  0x80   :  { %1777 = vmatpush2.bf16.msra.mxu1 %v3229_v13  ;;  %1787 = vmatprep.subr.bf16.mxu0 %v3238_v14  ;;  %v3325_v13 = vld [vmem:[%s4716_s3 + $0x32c] ss:$16 sps:$4 sm:$0xff]   ;;  %v3320_v14 = vld [vmem:[%s4716_s3 + $0x128] ss:$16 sps:$4 sm:$0xff]  }
  0x81   :  { %1828 = vmatprep.subr.bf16.mxu1 %v3241_v15  ;;  %v3323_v15 = vld [vmem:[%s4716_s3 + $0x328] ss:$16 sps:$4 sm:$0xff]  }
  0x82   :  { %1738 = vmatmul.mubr.bf16.vlgmr.msra.gmra.mxu0 %v4020_v16 }
  0x83   :  { %1779 = vmatmul.mubr.bf16.vlgmr.msra.gmra.mxu1 %v4024_v17  ;;  %1788 = vmatpush1.bf16.msra.mxu0 %v3236_v18  ;;  %v3328_v18 = vld [vmem:[%s4716_s3 + $0x10c] ss:$16 sps:$4 sm:$0xff]  }
  0x84   :  { %1829 = vmatpush1.bf16.msra.mxu1 %v3239_v19  ;;  %1789 = vmatprep.subr.bf16.mxu0 %v3244_v20  ;;  %v3331_v19 = vld [vmem:[%s4716_s3 + $0x30c] ss:$16 sps:$4 sm:$0xff]   ;;  %v3326_v20 = vld [vmem:[%s4716_s3 + $0x108] ss:$16 sps:$4 sm:$0xff]  }
  0x85   :  { %1830 = vmatprep.subr.bf16.mxu1 %v3247_v21  ;;  %1819 = vmatprep.mubr.bf16.mxu0 %v3731_v47  ;;  %v3259_v47 = vld [vmem:[%s4716_s3 + $0x28c] ss:$16 sps:$4 sm:$0xff]   ;;  %v3329_v21 = vld [vmem:[%s4716_s3 + $0x308] ss:$16 sps:$4 sm:$0xff]  }
  0x86   :  { %1860 = vmatprep.mubr.bf16.mxu1 %v3742_v51  ;;  %v3254_v51 = vld [vmem:[%s4716_s3 + $0x88] ss:$16 sps:$4 sm:$0xff]  }
  0x87   :  { %1790 = vmatpush1.bf16.msra.mxu0 %v3242_v22  ;;  %v3334_v22 = vld [vmem:[%s4716_s3 + $0x4ec] ss:$16 sps:$4 sm:$0xff]  }
  0x88   :  { %1831 = vmatpush1.bf16.msra.mxu1 %v3245_v23  ;;  %1791 = vmatprep.subr.bf16.mxu0 %v3250_v24  ;;  %v3337_v23 = vld [vmem:[%s4716_s3 + $0x6ec] ss:$16 sps:$4 sm:$0xff]   ;;  %v3332_v24 = vld [vmem:[%s4716_s3 + $0x4e8] ss:$16 sps:$4 sm:$0xff]  }
  0x89   :  { %1832 = vmatprep.subr.bf16.mxu1 %v3253_v25  ;;  %v3335_v25 = vld [vmem:[%s4716_s3 + $0x6e8] ss:$16 sps:$4 sm:$0xff]  }
  0x8b   :  { %1792 = vmatpush1.bf16.msra.mxu0 %v3248_v26  ;;  %v3340_v26 = vld [vmem:[%s4716_s3 + $0x4cc] ss:$16 sps:$4 sm:$0xff]  }
  0x8c   :  { %1833 = vmatpush1.bf16.msra.mxu1 %v3251_v27  ;;  %1793 = vmatprep.subr.bf16.mxu0 %v3256_v28  ;;  %v3343_v27 = vld [vmem:[%s4716_s3 + $0x6cc] ss:$16 sps:$4 sm:$0xff]   ;;  %v3338_v28 = vld [vmem:[%s4716_s3 + $0x4c8] ss:$16 sps:$4 sm:$0xff]  }
  0x8d   :  { %1834 = vmatprep.subr.bf16.mxu1 %v3259_v47  ;;  %v3341_v47 = vld [vmem:[%s4716_s3 + $0x6c8] ss:$16 sps:$4 sm:$0xff]  }
  0x8f   :  { %1794 = vmatpush1.bf16.msra.mxu0 %v3254_v51  ;;  %v3346_v51 = vld [vmem:[%s4716_s3 + $0x4ac] ss:$16 sps:$4 sm:$0xff]  }
  0x90   :  { %1835 = vmatpush1.bf16.msra.mxu1 %v3257_v29  ;;  %1795 = vmatprep.subr.bf16.mxu0 %v3262_v30  ;;  %v3349_v29 = vld [vmem:[%s4716_s3 + $0x6ac] ss:$16 sps:$4 sm:$0xff]   ;;  %v3344_v30 = vld [vmem:[%s4716_s3 + $0x4a8] ss:$16 sps:$4 sm:$0xff]  }
  0x91   :  { %1836 = vmatprep.subr.bf16.mxu1 %v3265_v31  ;;  %v3355_v31 = vld [vmem:[%s4716_s3 + $0x68c] ss:$16 sps:$4 sm:$0xff]  }
  0x93   :  { %1796 = vmatpush1.bf16.msra.mxu0 %v3260_v32  ;;  %v3350_v32 = vld [vmem:[%s4716_s3 + $0x488] ss:$16 sps:$4 sm:$0xff]  }
  0x94   :  { %1837 = vmatpush1.bf16.msra.mxu1 %v3263_v33  ;;  %1797 = vmatprep.subr.bf16.mxu0 %v3268_v34  ;;  %v3361_v33 = vld [vmem:[%s4716_s3 + $0x66c] ss:$16 sps:$4 sm:$0xff]   ;;  %v3356_v34 = vld [vmem:[%s4716_s3 + $0x468] ss:$16 sps:$4 sm:$0xff]  }
  0x95   :  { %1838 = vmatprep.subr.bf16.mxu1 %v3271_v35  ;;  %v3359_v35 = vld [vmem:[%s4716_s3 + $0x668] ss:$16 sps:$4 sm:$0xff]  }
  0x97   :  { %1798 = vmatpush1.bf16.msra.mxu0 %v3266_v38  ;;  %v3364_v38 = vld [vmem:[%s4716_s3 + $0x44c] ss:$16 sps:$4 sm:$0xff]  }
  0x98   :  { %1839 = vmatpush1.bf16.msra.mxu1 %v3269_v39  ;;  %1799 = vmatprep.subr.bf16.mxu0 %v3274_v40  ;;  %v3367_v39 = vld [vmem:[%s4716_s3 + $0x64c] ss:$16 sps:$4 sm:$0xff]   ;;  %v3362_v40 = vld [vmem:[%s4716_s3 + $0x448] ss:$16 sps:$4 sm:$0xff]  }
  0x99   :  { %1840 = vmatprep.subr.bf16.mxu1 %v3277_v41  ;;  %v3365_v41 = vld [vmem:[%s4716_s3 + $0x648] ss:$16 sps:$4 sm:$0xff]  }
  0x9b   :  { %1800 = vmatpush1.bf16.msra.mxu0 %v3272_v42  ;;  %v3370_v42 = vld [vmem:[%s4716_s3 + $0x42c] ss:$16 sps:$4 sm:$0xff]  }
  0x9c   :  { %1841 = vmatpush1.bf16.msra.mxu1 %v3275_v43  ;;  %1801 = vmatprep.subr.bf16.mxu0 %v3280_v44  ;;  %v3373_v43 = vld [vmem:[%s4716_s3 + $0x62c] ss:$16 sps:$4 sm:$0xff]   ;;  %v3368_v44 = vld [vmem:[%s4716_s3 + $0x428] ss:$16 sps:$4 sm:$0xff]  }
  0x9d   :  { %1842 = vmatprep.subr.bf16.mxu1 %v3283_v45  ;;  %v3371_v45 = vld [vmem:[%s4716_s3 + $0x628] ss:$16 sps:$4 sm:$0xff]  }
  0x9f   :  { %1802 = vmatpush1.bf16.msra.mxu0 %v3278_v46  ;;  %v3376_v46 = vld [vmem:[%s4716_s3 + $0x40c] ss:$16 sps:$4 sm:$0xff]  }
  0xa0   :  { %1843 = vmatpush1.bf16.msra.mxu1 %v3281_v48  ;;  %1803 = vmatprep.subr.bf16.mxu0 %v3286_v49  ;;  %v3379_v48 = vld [vmem:[%s4716_s3 + $0x60c] ss:$16 sps:$4 sm:$0xff]   ;;  %v3374_v49 = vld [vmem:[%s4716_s3 + $0x408] ss:$16 sps:$4 sm:$0xff]  }
  0xa1   :  { %1844 = vmatprep.subr.bf16.mxu1 %v3289_v50  ;;  %v3377_v50 = vld [vmem:[%s4716_s3 + $0x608] ss:$16 sps:$4 sm:$0xff]  }
  0xa3   :  { %1804 = vmatpush2.bf16.msra.mxu0 %v3284_v52  ;;  %v3382_v52 = vld [vmem:[%s4716_s3 + $0x5ec] ss:$16 sps:$4 sm:$0xff]  }
  0xa4   :  { %1845 = vmatpush2.bf16.msra.mxu1 %v3287_v53  ;;  %1805 = vmatprep.subr.bf16.mxu0 %v3292_v54  ;;  %v3385_v53 = vld [vmem:[%s4716_s3 + $0x7ec] ss:$16 sps:$4 sm:$0xff]   ;;  %v3380_v54 = vld [vmem:[%s4716_s3 + $0x5e8] ss:$16 sps:$4 sm:$0xff]  }
  0xa5   :  { %1846 = vmatprep.subr.bf16.mxu1 %v3295_v55  ;;  %v3383_v55 = vld [vmem:[%s4716_s3 + $0x7e8] ss:$16 sps:$4 sm:$0xff]  }
  0xa7   :  { %1806 = vmatpush2.bf16.msra.mxu0 %v3290_v56  ;;  %v3388_v56 = vld [vmem:[%s4716_s3 + $0x5cc] ss:$16 sps:$4 sm:$0xff]  }
  0xa8   :  { %1847 = vmatpush2.bf16.msra.mxu1 %v3293_v57  ;;  %1807 = vmatprep.subr.bf16.mxu0 %v3298_v58  ;;  %v3391_v57 = vld [vmem:[%s4716_s3 + $0x7cc] ss:$16 sps:$4 sm:$0xff]   ;;  %v3386_v58 = vld [vmem:[%s4716_s3 + $0x5c8] ss:$16 sps:$4 sm:$0xff]  }
  0xa9   :  { %1848 = vmatprep.subr.bf16.mxu1 %v3301_v59  ;;  %v3389_v59 = vld [vmem:[%s4716_s3 + $0x7c8] ss:$16 sps:$4 sm:$0xff]  }
  0xab   :  { %1808 = vmatpush2.bf16.msra.mxu0 %v3296_v60  ;;  %v3394_v60 = vld [vmem:[%s4716_s3 + $0x5ac] ss:$16 sps:$4 sm:$0xff]  }
  0xac   :  { %1849 = vmatpush2.bf16.msra.mxu1 %v3299_v61  ;;  %1809 = vmatprep.subr.bf16.mxu0 %v3304_v62  ;;  %v3397_v61 = vld [vmem:[%s4716_s3 + $0x7ac] ss:$16 sps:$4 sm:$0xff]   ;;  %v3392_v62 = vld [vmem:[%s4716_s3 + $0x5a8] ss:$16 sps:$4 sm:$0xff]  }
  0xad   :  { %1850 = vmatprep.subr.bf16.mxu1 %v3307_v63  ;;  %v3395_v63 = vld [vmem:[%s4716_s3 + $0x7a8] ss:$16 sps:$4 sm:$0xff]  }
  0xaf   :  { %1810 = vmatpush2.bf16.msra.mxu0 %v3302_v0  ;;  %v3400_v0 = vld [vmem:[%s4716_s3 + $0x58c] ss:$16 sps:$4 sm:$0xff]  }
  0xb0   :  { %1851 = vmatpush2.bf16.msra.mxu1 %v3305_v1  ;;  %1811 = vmatprep.subr.bf16.mxu0 %v3310_v2  ;;  %v3403_v1 = vld [vmem:[%s4716_s3 + $0x78c] ss:$16 sps:$4 sm:$0xff]   ;;  %v3398_v2 = vld [vmem:[%s4716_s3 + $0x588] ss:$16 sps:$4 sm:$0xff]  }
  0xb1   :  { %1852 = vmatprep.subr.bf16.mxu1 %v3313_v3  ;;  %v3401_v3 = vld [vmem:[%s4716_s3 + $0x788] ss:$16 sps:$4 sm:$0xff]  }
  0xb3   :  { %1812 = vmatpush2.bf16.msra.mxu0 %v3308_v4  ;;  %v3406_v4 = vld [vmem:[%s4716_s3 + $0x56c] ss:$16 sps:$4 sm:$0xff]  }
  0xb4   :  { %1853 = vmatpush2.bf16.msra.mxu1 %v3311_v5  ;;  %1813 = vmatprep.subr.bf16.mxu0 %v3316_v8  ;;  %v3409_v5 = vld [vmem:[%s4716_s3 + $0x76c] ss:$16 sps:$4 sm:$0xff]   ;;  %v3404_v8 = vld [vmem:[%s4716_s3 + $0x568] ss:$16 sps:$4 sm:$0xff]  }
  0xb5   :  { %1854 = vmatprep.subr.bf16.mxu1 %v3319_v9  ;;  %v3407_v9 = vld [vmem:[%s4716_s3 + $0x768] ss:$16 sps:$4 sm:$0xff]  }
  0xb7   :  { %1814 = vmatpush2.bf16.msra.mxu0 %v3314_v10  ;;  %v3412_v10 = vld [vmem:[%s4716_s3 + $0x54c] ss:$16 sps:$4 sm:$0xff]  }
  0xb8   :  { %1855 = vmatpush2.bf16.msra.mxu1 %v3317_v11  ;;  %1815 = vmatprep.subr.bf16.mxu0 %v3322_v12  ;;  %v3415_v11 = vld [vmem:[%s4716_s3 + $0x74c] ss:$16 sps:$4 sm:$0xff]   ;;  %v3410_v12 = vld [vmem:[%s4716_s3 + $0x548] ss:$16 sps:$4 sm:$0xff]  }
  0xb9   :  { %1856 = vmatprep.subr.bf16.mxu1 %v3325_v13  ;;  %v3413_v13 = vld [vmem:[%s4716_s3 + $0x748] ss:$16 sps:$4 sm:$0xff]  }
  0xbb   :  { %1816 = vmatpush2.bf16.msra.mxu0 %v3320_v14  ;;  %v3418_v14 = vld [vmem:[%s4716_s3 + $0x52c] ss:$16 sps:$4 sm:$0xff]  }
  0xbc   :  { %1857 = vmatpush2.bf16.msra.mxu1 %v3323_v15  ;;  %1817 = vmatprep.subr.bf16.mxu0 %v3328_v18  ;;  %v3421_v15 = vld [vmem:[%s4716_s3 + $0x72c] ss:$16 sps:$4 sm:$0xff]   ;;  %v3416_v18 = vld [vmem:[%s4716_s3 + $0x528] ss:$16 sps:$4 sm:$0xff]  }
  0xbd   :  { %1858 = vmatprep.subr.bf16.mxu1 %v3331_v19  ;;  %v3419_v19 = vld [vmem:[%s4716_s3 + $0x728] ss:$16 sps:$4 sm:$0xff]  }
  0xbf   :  { %1818 = vmatpush2.bf16.msra.mxu0 %v3326_v20  ;;  %v3424_v20 = vld [vmem:[%s4716_s3 + $0x50c] ss:$16 sps:$4 sm:$0xff]  }
  0xc0   :  { %1859 = vmatpush2.bf16.msra.mxu1 %v3329_v21  ;;  %1869 = vmatprep.subr.bf16.mxu0 %v3334_v22  ;;  %v3427_v21 = vld [vmem:[%s4716_s3 + $0x70c] ss:$16 sps:$4 sm:$0xff]   ;;  %v3422_v22 = vld [vmem:[%s4716_s3 + $0x508] ss:$16 sps:$4 sm:$0xff]  }
  0xc1   :  { %1910 = vmatprep.subr.bf16.mxu1 %v3337_v23  ;;  %v3425_v23 = vld [vmem:[%s4716_s3 + $0x708] ss:$16 sps:$4 sm:$0xff]  }
  0xc2   :  { %1820 = vmatmul.mubr.bf16.vlgmr.msra.gmra.mxu0 %v3800_v6  ;;  %v3347_v6 = vld [vmem:[%s4716_s3 + $0x6a8] ss:$16 sps:$4 sm:$0xff]  }
  0xc3   :  { %1861 = vmatmul.mubr.bf16.vlgmr.msra.gmra.mxu1 %v3802_v7  ;;  %1870 = vmatpush1.bf16.msra.mxu0 %v3332_v24  ;;  %v3352_v7 = vld [vmem:[%s4716_s3 + $0x48c] ss:$16 sps:$4 sm:$0xff]  }
  0xc4   :  { %1911 = vmatpush1.bf16.msra.mxu1 %v3335_v25  ;;  %1871 = vmatprep.subr.bf16.mxu0 %v3340_v26  ;;  %v3430_v24 = vld [vmem:[%s4718_s5 + $0x74] ss:$8 sps:$4 sm:$0xff]   ;;  %v3428_v25 = vld [vmem:[%s4718_s5 + $0x70] ss:$8 sps:$4 sm:$0xff]   ;;  %v3433_v26 = vld [vmem:[%s4718_s5 + $0x64] ss:$8 sps:$4 sm:$0xff]  }
  0xc5   :  { %1912 = vmatprep.subr.bf16.mxu1 %v3343_v27  ;;  %1901 = vmatprep.mubr.bf16.mxu0 %v3896_v36  ;;  %v3353_v36 = vld [vmem:[%s4716_s3 + $0x688] ss:$16 sps:$4 sm:$0xff]  }
  0xc6   :  { %1942 = vmatprep.mubr.bf16.mxu1 %v3900_v37  ;;  %v3358_v37 = vld [vmem:[%s4716_s3 + $0x46c] ss:$16 sps:$4 sm:$0xff]  }
  0xc7   :  { %1872 = vmatpush1.bf16.msra.mxu0 %v3338_v28 }
  0xc8   :  { %1913 = vmatpush1.bf16.msra.mxu1 %v3341_v47  ;;  %1873 = vmatprep.subr.bf16.mxu0 %v3346_v51  ;;  %v3431_v47 = vld [vmem:[%s4718_s5 + $0x60] ss:$8 sps:$4 sm:$0xff]  }
  0xc9   :  { %1914 = vmatprep.subr.bf16.mxu1 %v3349_v29 }
  0xcb   :  { %1874 = vmatpush1.bf16.msra.mxu0 %v3344_v30  ;;  %v3436_v30 = vld [vmem:[%s4718_s5 + $0x54] ss:$8 sps:$4 sm:$0xff]  }
  0xcc   :  { %1915 = vmatpush1.bf16.msra.mxu1 %v3347_v6  ;;  %1875 = vmatprep.subr.bf16.mxu0 %v3352_v7 }
  0xcd   :  { %1916 = vmatprep.subr.bf16.mxu1 %v3355_v31 }
  0xcf   :  { %1876 = vmatpush1.bf16.msra.mxu0 %v3350_v32  ;;  %v3439_v32 = vld [vmem:[%s4718_s5 + $0x44] ss:$8 sps:$4 sm:$0xff]  }
  0xd0   :  { %1917 = vmatpush1.bf16.msra.mxu1 %v3353_v36  ;;  %1877 = vmatprep.subr.bf16.mxu0 %v3358_v37  ;;  %v3476_v36 = vld [vmem:[%s4718_s5 + $0x170] ss:$8 sps:$4 sm:$0xff]   ;;  %v3478_v37 = vld [vmem:[%s4718_s5 + $0x174] ss:$8 sps:$4 sm:$0xff]  }
  0xd1   :  { %1918 = vmatprep.subr.bf16.mxu1 %v3361_v33  ;;  %v3481_v33 = vld [vmem:[%s4718_s5 + $0x164] ss:$8 sps:$4 sm:$0xff]  }
  0xd3   :  { %1878 = vmatpush1.bf16.msra.mxu0 %v3356_v34  ;;  %v3437_v34 = vld [vmem:[%s4718_s5 + $0x40] ss:$8 sps:$4 sm:$0xff]  }
  0xd4   :  { %1919 = vmatpush1.bf16.msra.mxu1 %v3359_v35  ;;  %1879 = vmatprep.subr.bf16.mxu0 %v3364_v38  ;;  %v3479_v35 = vld [vmem:[%s4718_s5 + $0x160] ss:$8 sps:$4 sm:$0xff]   ;;  %v3442_v38 = vld [vmem:[%s4718_s5 + $0x34] ss:$8 sps:$4 sm:$0xff]  }
  0xd5   :  { %1920 = vmatprep.subr.bf16.mxu1 %v3367_v39  ;;  %v3484_v39 = vld [vmem:[%s4718_s5 + $0x154] ss:$8 sps:$4 sm:$0xff]  }
  0xd7   :  { %1880 = vmatpush1.bf16.msra.mxu0 %v3362_v40  ;;  %v3440_v40 = vld [vmem:[%s4718_s5 + $0x30] ss:$8 sps:$4 sm:$0xff]  }
  0xd8   :  { %1921 = vmatpush1.bf16.msra.mxu1 %v3365_v41  ;;  %1881 = vmatprep.subr.bf16.mxu0 %v3370_v42  ;;  %v3482_v41 = vld [vmem:[%s4718_s5 + $0x150] ss:$8 sps:$4 sm:$0xff]   ;;  %v3445_v42 = vld [vmem:[%s4718_s5 + $0x24] ss:$8 sps:$4 sm:$0xff]  }
  0xd9   :  { %1922 = vmatprep.subr.bf16.mxu1 %v3373_v43  ;;  %v3487_v43 = vld [vmem:[%s4718_s5 + $0x144] ss:$8 sps:$4 sm:$0xff]  }
  0xdb   :  { %1882 = vmatpush1.bf16.msra.mxu0 %v3368_v44  ;;  %v3443_v44 = vld [vmem:[%s4718_s5 + $0x20] ss:$8 sps:$4 sm:$0xff]  }
  0xdc   :  { %1923 = vmatpush1.bf16.msra.mxu1 %v3371_v45  ;;  %1883 = vmatprep.subr.bf16.mxu0 %v3376_v46  ;;  %v3485_v45 = vld [vmem:[%s4718_s5 + $0x140] ss:$8 sps:$4 sm:$0xff]   ;;  %v3448_v46 = vld [vmem:[%s4718_s5 + $0x14] ss:$8 sps:$4 sm:$0xff]  }
  0xdd   :  { %1924 = vmatprep.subr.bf16.mxu1 %v3379_v48  ;;  %v3490_v48 = vld [vmem:[%s4718_s5 + $0x134] ss:$8 sps:$4 sm:$0xff]  }
  0xdf   :  { %1884 = vmatpush1.bf16.msra.mxu0 %v3374_v49  ;;  %v3446_v49 = vld [vmem:[%s4718_s5 + $0x10] ss:$8 sps:$4 sm:$0xff]  }
  0xe0   :  { %1925 = vmatpush1.bf16.msra.mxu1 %v3377_v50  ;;  %1885 = vmatprep.subr.bf16.mxu0 %v3382_v52  ;;  %v3488_v50 = vld [vmem:[%s4718_s5 + $0x130] ss:$8 sps:$4 sm:$0xff]   ;;  %v3451_v52 = vld [vmem:[%s4718_s5 + $0x4] ss:$8 sps:$4 sm:$0xff]  }
  0xe1   :  { %1926 = vmatprep.subr.bf16.mxu1 %v3385_v53  ;;  %v3493_v53 = vld [vmem:[%s4718_s5 + $0x124] ss:$8 sps:$4 sm:$0xff]  }
  0xe3   :  { %1886 = vmatpush2.bf16.msra.mxu0 %v3380_v54  ;;  %v3449_v54 = vld [vmem:[%s4718_s5] ss:$8 sps:$4 sm:$0xff]  }
  0xe4   :  { %1927 = vmatpush2.bf16.msra.mxu1 %v3383_v55  ;;  %1887 = vmatprep.subr.bf16.mxu0 %v3388_v56  ;;  %v3491_v55 = vld [vmem:[%s4718_s5 + $0x120] ss:$8 sps:$4 sm:$0xff]   ;;  %v3454_v56 = vld [vmem:[%s4718_s5 + $0xf4] ss:$8 sps:$4 sm:$0xff]  }
  0xe5   :  { %1928 = vmatprep.subr.bf16.mxu1 %v3391_v57  ;;  %v3496_v57 = vld [vmem:[%s4718_s5 + $0x114] ss:$8 sps:$4 sm:$0xff]  }
  0xe7   :  { %1888 = vmatpush2.bf16.msra.mxu0 %v3386_v58  ;;  %v3452_v58 = vld [vmem:[%s4718_s5 + $0xf0] ss:$8 sps:$4 sm:$0xff]  }
  0xe8   :  { %1929 = vmatpush2.bf16.msra.mxu1 %v3389_v59  ;;  %1889 = vmatprep.subr.bf16.mxu0 %v3394_v60  ;;  %v3494_v59 = vld [vmem:[%s4718_s5 + $0x110] ss:$8 sps:$4 sm:$0xff]   ;;  %v3457_v60 = vld [vmem:[%s4718_s5 + $0xe4] ss:$8 sps:$4 sm:$0xff]  }
  0xe9   :  { %1930 = vmatprep.subr.bf16.mxu1 %v3397_v61  ;;  %v3499_v61 = vld [vmem:[%s4718_s5 + $0x104] ss:$8 sps:$4 sm:$0xff]  }
  0xeb   :  { %1890 = vmatpush2.bf16.msra.mxu0 %v3392_v62  ;;  %v3455_v62 = vld [vmem:[%s4718_s5 + $0xe0] ss:$8 sps:$4 sm:$0xff]  }
  0xec   :  { %1931 = vmatpush2.bf16.msra.mxu1 %v3395_v63  ;;  %1891 = vmatprep.subr.bf16.mxu0 %v3400_v0  ;;  %v3497_v63 = vld [vmem:[%s4718_s5 + $0x100] ss:$8 sps:$4 sm:$0xff]   ;;  %v3460_v0 = vld [vmem:[%s4718_s5 + $0xd4] ss:$8 sps:$4 sm:$0xff]  }
  0xed   :  { %1932 = vmatprep.subr.bf16.mxu1 %v3403_v1  ;;  %v3502_v1 = vld [vmem:[%s4718_s5 + $0x1f4] ss:$8 sps:$4 sm:$0xff]  }
  0xef   :  { %1892 = vmatpush2.bf16.msra.mxu0 %v3398_v2  ;;  %v3458_v2 = vld [vmem:[%s4718_s5 + $0xd0] ss:$8 sps:$4 sm:$0xff]  }
  0xf0   :  { %1933 = vmatpush2.bf16.msra.mxu1 %v3401_v3  ;;  %1893 = vmatprep.subr.bf16.mxu0 %v3406_v4  ;;  %v3500_v3 = vld [vmem:[%s4718_s5 + $0x1f0] ss:$8 sps:$4 sm:$0xff]   ;;  %v3463_v4 = vld [vmem:[%s4718_s5 + $0xc4] ss:$8 sps:$4 sm:$0xff]  }
  0xf1   :  { %1934 = vmatprep.subr.bf16.mxu1 %v3409_v5  ;;  %v3505_v5 = vld [vmem:[%s4718_s5 + $0x1e4] ss:$8 sps:$4 sm:$0xff]  }
  0xf3   :  { %1894 = vmatpush2.bf16.msra.mxu0 %v3404_v8  ;;  %v3461_v8 = vld [vmem:[%s4718_s5 + $0xc0] ss:$8 sps:$4 sm:$0xff]  }
  0xf4   :  { %1935 = vmatpush2.bf16.msra.mxu1 %v3407_v9  ;;  %1895 = vmatprep.subr.bf16.mxu0 %v3412_v10  ;;  %v3503_v9 = vld [vmem:[%s4718_s5 + $0x1e0] ss:$8 sps:$4 sm:$0xff]   ;;  %v3466_v10 = vld [vmem:[%s4718_s5 + $0xb4] ss:$8 sps:$4 sm:$0xff]  }
  0xf5   :  { %1936 = vmatprep.subr.bf16.mxu1 %v3415_v11  ;;  %v3508_v11 = vld [vmem:[%s4718_s5 + $0x1d4] ss:$8 sps:$4 sm:$0xff]  }
  0xf7   :  { %1896 = vmatpush2.bf16.msra.mxu0 %v3410_v12  ;;  %v295_v12 = vlaneseq }
  0xf8   :  { %1937 = vmatpush2.bf16.msra.mxu1 %v3413_v13  ;;  %1897 = vmatprep.subr.bf16.mxu0 %v3418_v14  ;;  %v3464_v13 = vld [vmem:[%s4718_s5 + $0xb0] ss:$8 sps:$4 sm:$0xff]  }
  0xf9   :  { %1938 = vmatprep.subr.bf16.mxu1 %v3421_v15  ;;  %v3506_v14 = vld [vmem:[%s4718_s5 + $0x1d0] ss:$8 sps:$4 sm:$0xff]   ;;  %v3469_v15 = vld [vmem:[%s4718_s5 + $0xa4] ss:$8 sps:$4 sm:$0xff]  }
  0xfb   :  { %1898 = vmatpush2.bf16.msra.mxu0 %v3416_v18  ;;  %v3511_v18 = vld [vmem:[%s4718_s5 + $0x1c4] ss:$8 sps:$4 sm:$0xff]  }
  0xfc   :  { %1939 = vmatpush2.bf16.msra.mxu1 %v3419_v19  ;;  %1899 = vmatprep.subr.bf16.mxu0 %v3424_v20  ;;  %v4572_v19 = vshrl.u32 %v295_v12, 7  ;;  %v3467_v20 = vld [vmem:[%s4718_s5 + $0xa0] ss:$8 sps:$4 sm:$0xff]   ;;  %v3533_v12 = vld [vmem:[%s4721_s7 + $0x18] sm:$0xff]  }
  0xfd   :  { %1940 = vmatprep.subr.bf16.mxu1 %v3427_v21  ;;  %v3509_v21 = vld [vmem:[%s4718_s5 + $0x1c0] ss:$8 sps:$4 sm:$0xff]  }
  0xff   :  { %1900 = vmatpush2.bf16.msra.mxu0 %v3422_v22  ;;  %v3472_v22 = vld [vmem:[%s4718_s5 + $0x94] ss:$8 sps:$4 sm:$0xff]  }
 0x100   :  { %1941 = vmatpush2.bf16.msra.mxu1 %v3425_v23  ;;  %2375 = vmatprep.subr.bf16.mxu0 %v3430_v24  ;;  %v3514_v23 = vld [vmem:[%s4718_s5 + $0x1b4] ss:$8 sps:$4 sm:$0xff]   ;;  %v297_v24 = vsub.s32 0, %v4572_v19 }
 0x101   :  { %2416 = vmatprep.subr.bf16.mxu1 %v3478_v37 }
 0x102   :  { %v4421_v27 = vpop.f32.mrf.mxu0  ;;  %1902 = vmatmul.mubr.bf16.vlgmr.msra.gmra.mxu0 %v4020_v16  ;;  %v3434_v16 = vld [vmem:[%s4718_s5 + $0x50] ss:$8 sps:$4 sm:$0xff]  }
 0x103   :  { %v4423_v28 = vpop.f32.mrf.mxu1  ;;  %1943 = vmatmul.mubr.bf16.vlgmr.msra.gmra.mxu1 %v4024_v17  ;;  %2376 = vmatpush1.bf16.msra.mxu0 %v3428_v25  ;;  %v4590_v25 = vld [vmem:[%s4719_s4] sm:$0xf] }
 0x104   :  { %v4430_v51 = vpop.f32.mrf.mxu0  ;;  %2377 = vmatprep.subr.bf16.mxu0 %v3433_v26  ;;  %2417 = vmatpush1.bf16.msra.mxu1 %v3476_v36  ;;  %v301_v26 = vsub.s32 1, %v4572_v19  ;;  %v3517_v36 = vld [vmem:[%s4718_s5 + $0x1a4] ss:$8 sps:$4 sm:$0xff]  }
 0x105   :  { %v4432_v29 = vpop.f32.mrf.mxu1  ;;  %2418 = vmatprep.subr.bf16.mxu1 %v3481_v33  ;;  %v3515_v33 = vld [vmem:[%s4718_s5 + $0x1a0] ss:$8 sps:$4 sm:$0xff]  }
 0x106   :  { %v1661_v6 = vpop.f32.mrf.mxu0 }
 0x107   :  { %v1702_v7 = vpop.f32.mrf.mxu1  ;;  %2378 = vmatpush1.bf16.msra.mxu0 %v3431_v47  ;;  %v3470_v47 = vld [vmem:[%s4718_s5 + $0x90] ss:$8 sps:$4 sm:$0xff]   ;;  %v3475_v6 = vld [vmem:[%s4718_s5 + $0x84] ss:$8 sps:$4 sm:$0xff]  }
 0x108   :  { %v1662_v17 = vpop.f32.mrf.mxu0  ;;  %2379 = vmatprep.subr.bf16.mxu0 %v3436_v30  ;;  %2419 = vmatpush1.bf16.msra.mxu1 %v3479_v35  ;;  %v3512_v30 = vld [vmem:[%s4718_s5 + $0x1b0] ss:$8 sps:$4 sm:$0xff]   ;;  %v298_v7 = vrot.slane %v4590_v25, %v297_v24 }
 0x109   :  { %v1703_v31 = vpop.f32.mrf.mxu1  ;;  %2420 = vmatprep.subr.bf16.mxu1 %v3484_v39  ;;  %v3473_v17 = vld [vmem:[%s4718_s5 + $0x80] ss:$8 sps:$4 sm:$0xff]  }
 0x10a   :  { %v1658_v31 = vadd.f32 %v4421_v27, %v298_v7  ;;  %v1951_v27 = vld [vmem:[%s4720_s1] sm:$0xff] }
 0x10b   :  { %2380 = vmatpush1.bf16.msra.mxu0 %v3434_v16  ;;  %v302_v16 = vrot.slane %v4590_v25, %v301_v26  ;;  %vm1955_vm0 = vcmp.ge.u32.totalorder %v1951_v27, 644245094 }
 0x10c   :  { %2381 = vmatprep.subr.bf16.mxu0 %v3439_v32  ;;  %2421 = vmatpush1.bf16.msra.mxu1 %v3482_v41  ;;  %v1699_v37 = vadd.f32 %v4423_v28, %v1658_v31  ;;  %v1952_v28 = vld [vmem:[%s4720_s1 + $0x8] sm:$0xff]  ;;  %v3520_v41 = vld [vmem:[%s4718_s5 + $0x194] ss:$8 sps:$4 sm:$0xff]  }
 0x10d   :  { %2422 = vmatprep.subr.bf16.mxu1 %v3487_v43  ;;  %v1660_v32 = vadd.f32 %v4430_v51, %v302_v16  ;;  %vm1956_vm2 = vcmp.ge.u32.totalorder %v1952_v28, 644245094 }
 0x10f   :  { %2382 = vmatpush1.bf16.msra.mxu0 %v3437_v34 }
 0x110   :  { %2383 = vmatprep.subr.bf16.mxu0 %v3442_v38  ;;  %2423 = vmatpush1.bf16.msra.mxu1 %v3485_v45  ;;  %v1701_v38 = vadd.f32 %v4432_v29, %v1660_v32  ;;  %v3518_v29 = vld [vmem:[%s4718_s5 + $0x190] ss:$8 sps:$4 sm:$0xff]  }
 0x111   :  { %2424 = vmatprep.subr.bf16.mxu1 %v3490_v48 }
 0x113   :  { %2384 = vmatpush1.bf16.msra.mxu0 %v3440_v40 }
 0x114   :  { %2385 = vmatprep.subr.bf16.mxu0 %v3445_v42  ;;  %2425 = vmatpush1.bf16.msra.mxu1 %v3488_v50 }
 0x115   :  { %2426 = vmatprep.subr.bf16.mxu1 %v3493_v53 }
 0x117   :  { %2386 = vmatpush1.bf16.msra.mxu0 %v3443_v44 }
 0x118   :  { %2387 = vmatprep.subr.bf16.mxu0 %v3448_v46  ;;  %2427 = vmatpush1.bf16.msra.mxu1 %v3491_v55 }
 0x119   :  { %2428 = vmatprep.subr.bf16.mxu1 %v3496_v57 }
 0x11b   :  { %2388 = vmatpush1.bf16.msra.mxu0 %v3446_v49 }
 0x11c   :  { %2389 = vmatprep.subr.bf16.mxu0 %v3451_v52  ;;  %2429 = vmatpush1.bf16.msra.mxu1 %v3494_v59  ;;  %v3523_v52 = vld [vmem:[%s4718_s5 + $0x184] ss:$8 sps:$4 sm:$0xff]  }
 0x11d   :  { %2430 = vmatprep.subr.bf16.mxu1 %v3499_v61 }
 0x11f   :  { %2390 = vmatpush1.bf16.msra.mxu0 %v3449_v54  ;;  %v3521_v54 = vld [vmem:[%s4718_s5 + $0x180] ss:$8 sps:$4 sm:$0xff]  }
 0x120   :  { %2391 = vmatprep.subr.bf16.mxu0 %v3454_v56  ;;  %2431 = vmatpush1.bf16.msra.mxu1 %v3497_v63 }
 0x121   :  { %2432 = vmatprep.subr.bf16.mxu1 %v3502_v1  ;;  %v3524_v1 = vld [vmem:[%s4721_s7 + $0x78] sm:$0xff]  }
 0x123   :  { %2392 = vmatpush2.bf16.msra.mxu0 %v3452_v58 }
 0x124   :  { %2393 = vmatprep.subr.bf16.mxu0 %v3457_v60  ;;  %2433 = vmatpush2.bf16.msra.mxu1 %v3500_v3  ;;  %v3526_v3 = vld [vmem:[%s4721_s7 + $0x70] sm:$0xff]  }
 0x125   :  { %2434 = vmatprep.subr.bf16.mxu1 %v3505_v5  ;;  %v3528_v5 = vld [vmem:[%s4721_s7 + $0x68] sm:$0xff]  }
 0x127   :  { %2394 = vmatpush2.bf16.msra.mxu0 %v3455_v62 }
 0x128   :  { %2395 = vmatprep.subr.bf16.mxu0 %v3460_v0  ;;  %2435 = vmatpush2.bf16.msra.mxu1 %v3503_v9  ;;  %v3530_v9 = vld [vmem:[%s4721_s7 + $0x60] sm:$0xff]  }
 0x129   :  { %2436 = vmatprep.subr.bf16.mxu1 %v3508_v11  ;;  %v3532_v11 = vld [vmem:[%s4721_s7 + $0x58] sm:$0xff]  }
 0x12b   :  { %2396 = vmatpush2.bf16.msra.mxu0 %v3458_v2  ;;  %v3525_v2 = vld [vmem:[%s4721_s7 + $0x38] sm:$0xff]  }
 0x12c   :  { %2397 = vmatprep.subr.bf16.mxu0 %v3463_v4  ;;  %2437 = vmatpush2.bf16.msra.mxu1 %v3506_v14  ;;  %v3527_v4 = vld [vmem:[%s4721_s7 + $0x30] sm:$0xff]  }
 0x12d   :  { %2438 = vmatprep.subr.bf16.mxu1 %v3511_v18  ;;  %v3535_v14 = vld [vmem:[%s4721_s7 + $0x10] sm:$0xff]   ;;  %v309_v18 = vsub.s32 3, %v4572_v19 }
 0x12f   :  { %2398 = vmatpush2.bf16.msra.mxu0 %v3461_v8  ;;  %v3529_v8 = vld [vmem:[%s4721_s7 + $0x28] sm:$0xff]  }
 0x130   :  { %2399 = vmatprep.subr.bf16.mxu0 %v3466_v10  ;;  %2439 = vmatpush2.bf16.msra.mxu1 %v3509_v21  ;;  %v3531_v10 = vld [vmem:[%s4721_s7 + $0x20] sm:$0xff]   ;;  %v310_v21 = vrot.slane %v4590_v25, %v309_v18 }
 0x131   :  { %2440 = vmatprep.subr.bf16.mxu1 %v3514_v23 }
 0x133   :  { %2400 = vmatpush2.bf16.msra.mxu0 %v3464_v13  ;;  %v3534_v13 = vld [vmem:[%s4721_s7 + $0x50] sm:$0xff]  }
 0x134   :  { %2401 = vmatprep.subr.bf16.mxu0 %v3469_v15  ;;  %2441 = vmatpush2.bf16.msra.mxu1 %v3512_v30  ;;  %v305_v15 = vsub.s32 2, %v4572_v19 }
 0x135   :  { %2442 = vmatprep.subr.bf16.mxu1 %v3517_v36  ;;  %v1954_v36 = vld [vmem:[%s4720_s1 + $0x18] sm:$0xff] }
 0x136   :  { %vm1958_vm10 = vcmp.ge.u32.totalorder %v1954_v36, 644245094 }
 0x137   :  { %2402 = vmatpush2.bf16.msra.mxu0 %v3467_v20  ;;  %v306_v20 = vrot.slane %v4590_v25, %v305_v15 }
 0x138   :  { %2403 = vmatprep.subr.bf16.mxu0 %v3472_v22  ;;  %2443 = vmatpush2.bf16.msra.mxu1 %v3515_v33 }
 0x139   :  { %2444 = vmatprep.subr.bf16.mxu1 %v3520_v41 }
 0x13b   :  { %2404 = vmatpush2.bf16.msra.mxu0 %v3470_v47 }
 0x13c   :  { %2405 = vmatprep.subr.bf16.mxu0 %v3475_v6  ;;  %2445 = vmatpush2.bf16.msra.mxu1 %v3518_v29 }
 0x13d   :  { %2446 = vmatprep.subr.bf16.mxu1 %v3523_v52 }
 0x13f   :  { %2406 = vmatpush2.bf16.msra.mxu0 %v3473_v17  ;;  %v1953_v17 = vld [vmem:[%s4720_s1 + $0x10] sm:$0xff] }
 0x140   :  { %2447 = vmatpush2.bf16.msra.mxu1 %v3521_v54  ;;  %3014 = vmatprep.subr.bf16.mxu0 %v3524_v1  ;;  %vm1957_vm8 = vcmp.ge.u32.totalorder %v1953_v17, 644245094  ;;  %v2457_v54 = vld [vmem:[%s4723_s2] sm:$0xff] }
 0x141   :  { %v2991_v1 = vld [vmem:[%s4724_s8] ss:$0 sm:$0xff] }
 0x142   :  { %v1739_v34 = vpop.f32.mrf.mxu0 }
 0x143   :  { %v1780_v35 = vpop.f32.mrf.mxu1  ;;  %v1740_v39 = vadd.f32 %v1739_v34, %v1699_v37 }
 0x144   :  { %v1741_v51 = vpop.f32.mrf.mxu0 }
 0x145   :  { %v1782_v40 = vpop.f32.mrf.mxu1  ;;  %v1781_v42 = vadd.f32 %v1780_v35, %v1740_v39  ;;  %v1742_v43 = vadd.f32 %v1741_v51, %v1701_v38 }
 0x146   :  { %v1743_v44 = vpop.f32.mrf.mxu0 }
 0x147   :  { %v1784_v45 = vpop.f32.mrf.mxu1  ;;  %vm1959_vm1 = vcmp.gt.f32.partialorder %v1781_v42, 0.0  ;;  %v1783_v46 = vadd.f32 %v1782_v40, %v1742_v43  ;;  %v1967_v48 = vmul.f32 1.1764706, %v1781_v42  ;;  %v3536_v42 = vld [vmem:[%s4721_s7 + $0x48] sm:$0xff]  }
 0x148   :  { %v1744_v49 = vpop.f32.mrf.mxu0  ;;  %vm1963_vm3 = vmand %vm1955_vm0, %vm1959_vm1  ;;  %v3537_v43 = vld [vmem:[%s4721_s7 + $0x8] sm:$0xff]   ;;  %v3538_v45 = vld [vmem:[%s4721_s7 + $0x40] sm:$0xff]   ;;  %vm2459_vm0 = vcmp.ge.u32.totalorder %v2457_v54, 644245094 }
 0x149   :  { %v1785_v50 = vpop.f32.mrf.mxu1  ;;  %vm1960_vm4 = vcmp.gt.f32.partialorder %v1783_v46, 0.0  ;;  %v1968_v53 = vmul.f32 1.1764706, %v1783_v46  ;;  %v2983_v56 = vpack.c.bf16 %v1967_v48, %v1967_v48  ;;  %vm2982_vm7 = vmpackc.low %vm1963_vm3, %vm1963_vm3  ;;  %v3539_v46 = vld [vmem:[%s4721_s7] sm:$0xff]  }
 0x14a   :  { %vm1964_vm5 = vmand %vm1956_vm2, %vm1960_vm4  ;;  %v2043_v49 = vld [vmem:[%s4722_s6] sm:$0x3] }
 0x14b   :  { %v2980_v55 = vpack.c.bf16 %v1968_v53, %v1968_v53  ;;  %vm2979_vm6 = vmpackc.low %vm1964_vm5, %vm1964_vm5  ;;  %v2048_v50 = vrot.slane %v2043_v49, %v297_v24  ;;  %v2052_v52 = vrot.slane %v2043_v49, %v301_v26 }
 0x14d   :  { %2981 = vmatprep.mubr.msk.bf16.mxu0 %vm2979_vm6, %v2980_v55 }
 0x14e   :  { %2984 = vmatmul.mubr.msk.bf16.vlgmr.msra.gmra.mxu0 %vm2982_vm7, %v2983_v56  ;;  %v2458_v56 = vld [vmem:[%s4723_s2 + $0x8] sm:$0xff] }
 0x14f   :  { %3015 = vmatpush3.bf16.msra.mxu0 %v3525_v2  ;;  %vm2460_vm2 = vcmp.ge.u32.totalorder %v2458_v56, 644245094 }
 0x150   :  { %3016 = vmatprep.subr.bf16.mxu0 %v3526_v3 }
 0x153   :  { %3017 = vmatpush3.bf16.msra.mxu0 %v3527_v4 }
 0x154   :  { %3018 = vmatprep.subr.bf16.mxu0 %v3528_v5 }
 0x157   :  { %3019 = vmatpush3.bf16.msra.mxu0 %v3529_v8 }
 0x158   :  { %3020 = vmatprep.subr.bf16.mxu0 %v3530_v9 }
 0x15b   :  { %3021 = vmatpush3.bf16.msra.mxu0 %v3531_v10 }
 0x15c   :  { %3022 = vmatprep.subr.bf16.mxu0 %v3532_v11 }
 0x15f   :  { %3023 = vmatpush3.bf16.msra.mxu0 %v3533_v12 }
 0x160   :  { %3024 = vmatprep.subr.bf16.mxu0 %v3534_v13 }
 0x163   :  { %3025 = vmatpush3.bf16.msra.mxu0 %v3535_v14 }
 0x164   :  { %3026 = vmatprep.subr.bf16.mxu0 %v3536_v42 }
 0x167   :  { %3027 = vmatpush3.bf16.msra.mxu0 %v3537_v43 }
 0x168   :  { %3028 = vmatprep.subr.bf16.mxu0 %v3538_v45 }
 0x16b   :  { %3029 = vmatpush3.bf16.msra.mxu0 %v3539_v46 }
 0x182   :  { %v1821_v57 = vpop.f32.mrf.mxu0 }
 0x183   :  { %v1862_v58 = vpop.f32.mrf.mxu1  ;;  %v1822_v22 = vadd.f32 %v1821_v57, %v306_v20 }
 0x184   :  { %v1823_v59 = vpop.f32.mrf.mxu0 }
 0x185   :  { %v1864_v60 = vpop.f32.mrf.mxu1  ;;  %v1824_v23 = vadd.f32 %v1823_v59, %v310_v21  ;;  %v1863_v47 = vadd.f32 %v1862_v58, %v1822_v22 }
 0x186   :  { %v1825_v61 = vpop.f32.mrf.mxu0 }
 0x187   :  { %v1866_v62 = vpop.f32.mrf.mxu1  ;;  %v1865_v7 = vadd.f32 %v1864_v60, %v1824_v23 }
 0x188   :  { %v1826_v63 = vpop.f32.mrf.mxu0 }
 0x189   :  { %v1867_v0 = vpop.f32.mrf.mxu1 }
 0x1c2   :  { %v1903_v30 = vpop.f32.mrf.mxu0 }
 0x1c3   :  { %v1944_v6 = vpop.f32.mrf.mxu1  ;;  %v1904_v16 = vadd.f32 %v1903_v30, %v1863_v47 }
 0x1c4   :  { %v1905_v31 = vpop.f32.mrf.mxu0 }
 0x1c5   :  { %v1946_v32 = vpop.f32.mrf.mxu1  ;;  %v1945_v37 = vadd.f32 %v1944_v6, %v1904_v16  ;;  %v1906_v33 = vadd.f32 %v1905_v31, %v1865_v7 }
 0x1c6   :  { %v1907_v25 = vpop.f32.mrf.mxu0 }
 0x1c7   :  { %v1948_v34 = vpop.f32.mrf.mxu1  ;;  %vm1961_vm9 = vcmp.gt.f32.partialorder %v1945_v37, 0.0  ;;  %v1947_v35 = vadd.f32 %v1946_v32, %v1906_v33  ;;  %v1969_v38 = vmul.f32 1.1764706, %v1945_v37 }
 0x1c8   :  { %v1908_v39 = vpop.f32.mrf.mxu0  ;;  %vm1965_vm11 = vmand %vm1957_vm8, %vm1961_vm9 }
 0x1c9   :  { %v1949_v27 = vpop.f32.mrf.mxu1  ;;  %vm1962_vm12 = vcmp.gt.f32.partialorder %v1947_v35, 0.0  ;;  %v1970_v51 = vmul.f32 1.1764706, %v1947_v35  ;;  %v2989_v28 = vpack.c.bf16 %v1969_v38, %v1969_v38  ;;  %vm2988_vm15 = vmpackc.low %vm1965_vm11, %vm1965_vm11 }
 0x1ca   :  { %vm1966_vm13 = vmand %vm1958_vm10, %vm1962_vm12 }
 0x1cb   :  { %v2986_v40 = vpack.c.bf16 %v1970_v51, %v1970_v51  ;;  %vm2985_vm14 = vmpackc.low %vm1966_vm13, %vm1966_vm13 }
 0x1cd   :  { %2987 = vmatprep.mubr.msk.bf16.mxu1 %vm2985_vm14, %v2986_v40 }
 0x1ce   :  { %2990 = vmatmul.mubr.msk.bf16.vlgmr.msra.gmra.mxu1 %vm2988_vm15, %v2989_v28 }
 0x20e   :  { %v2409_v41 = vpop.f32.mrf.mxu0 }
 0x20f   :  { %v2410_v53 = vadd.f32 %v2409_v41, %v2048_v50 }
 0x210   :  { %v2411_v29 = vpop.f32.mrf.mxu0 }
 0x211   :  { %v2412_v57 = vadd.f32 %v2411_v29, %v2052_v52 }
 0x212   :  { %v2413_v44 = vpop.f32.mrf.mxu0 }
 0x214   :  { %v2414_v48 = vpop.f32.mrf.mxu0 }
 0x28e   :  { %v2450_v55 = vpop.f32.mrf.mxu1 }
 0x28f   :  { %v2451_v58 = vadd.f32 %v2450_v55, %v2410_v53 }
 0x290   :  { %v2452_v59 = vpop.f32.mrf.mxu1 }
 0x291   :  { %vm2461_vm1 = vcmp.gt.f32.partialorder %v2451_v58, 0.0  ;;  %v2453_v60 = vadd.f32 %v2452_v59, %v2412_v57  ;;  %v2465_v24 = vmul.f32 1.1764706, %v2451_v58 }
 0x292   :  { %v2454_v19 = vpop.f32.mrf.mxu1  ;;  %vm2463_vm3 = vmand %vm2459_vm0, %vm2461_vm1 }
 0x293   :  { %vm2462_vm4 = vcmp.gt.f32.partialorder %v2453_v60, 0.0  ;;  %v2466_v26 = vmul.f32 1.1764706, %v2453_v60  ;;  %v3012_v63 = vpack.c.bf16 %v2465_v24, %v2465_v24  ;;  %vm3011_vm7 = vmpackc.low %vm2463_vm3, %vm2463_vm3 }
 0x294   :  { %vm2464_vm5 = vmand %vm2460_vm2, %vm2462_vm4  ;;  %v2455_v61 = vpop.f32.mrf.mxu1 }
 0x295   :  { %v3009_v62 = vpack.c.bf16 %v2466_v26, %v2466_v26  ;;  %vm3008_vm6 = vmpackc.low %vm2464_vm5, %vm2464_vm5 }
 0x297   :  { %3010 = vmatprep.mubr.msk.bf16.mxu0 %vm3008_vm6, %v3009_v62 }
 0x298   :  { %3013 = vmatmul.mubr.msk.bf16.vlgmr.msra.gmra.mxu0 %vm3011_vm7, %v3012_v63 }
 0x358   :  { %v3030_v0 = vpop.f32.mrf.mxu0 }
 0x35a   :  { %v3031_v2 = vpop.f32.mrf.mxu0 }
 0x35b   :  { %v3032_v3 = vadd.f32 %v3031_v2, %v3030_v0 }
 0x35c   :  { %v3033_v4 = vpop.f32.mrf.mxu0 }
 0x35d   :  { %v2641_v5 = vadd.f32 %v3032_v3, %v2991_v1 }
 0x35e   :  { %v3034_v8 = vpop.f32.mrf.mxu0 }
 0x35f   :  { %2646 = vst [vmem:[%s4725_s9] sm:$0xff] %v2641_v5 }

</bundles_post_ra>
